<compile_context>
chip_gen: v7x
topology: tpu7x:2x2x1
jax: 0.10.0
libtpu: 0.0.40
codegen_flags: <defaults>
</compile_context>

<pallas_src>
import numpy as np

import jax
import jax.numpy as jnp
from jax.experimental import pallas as pl
from jax.experimental.pallas import tpu as pltpu

DIM = 8    # `dimension` global in cgan/model.py (kept small for the demo)
LANE = 128  # activation slabs / gather groups are padded to 128 lanes

# (cin, cout, kernel, stride, pad, use_bn, use_leaky_relu)
_LAYER_CFG = (
    (3,       DIM,     4, 2, 1, False, True),
    (DIM,     DIM * 2, 4, 2, 1, True,  True),
    (DIM * 2, DIM * 4, 4, 2, 1, True,  True),
    (DIM * 4, DIM * 8, 4, 2, 1, True,  True),
    (DIM * 8, 1,       2, 1, 0, False, False),
)


def _out_sz(s, k, stride, pad):
    return (s + 2 * pad - k) // stride + 1


def _round_up(x, m):
    return (x + m - 1) // m * m


def _layer_meta(n, h, w):
    """Static per-layer geometry derived from batch / input spatial size."""
    meta = []
    for (cin, cout, k, stride, pad, use_bn, use_act) in _LAYER_CFG:
        ho, wo = _out_sz(h, k, stride, pad), _out_sz(w, k, stride, pad)
        meta.append(dict(cin=cin, cout=cout, k=k, stride=stride, pad=pad,
                         h=h, w=w, ho=ho, wo=wo, hp=h + 2 * pad, n=n,
                         group=_round_up(w * cin, LANE),
                         use_bn=use_bn, use_act=use_act))
        h, w = ho, wo
    return meta


# ---------------------------------------------------------------------------
# Small in-kernel helpers (all VPU / lane work, no MXU)
# ---------------------------------------------------------------------------
def _lane_group_sum(v, groups, width):
    """Sum a (1, groups*width) row over its lane groups -> (1, width)."""
    acc = v[:, :width]
    for g in range(1, groups):
        acc = acc + v[:, g * width:(g + 1) * width]
    return acc


def _lane_tile(v, reps):
    """Tile a (1, width) row `reps` times along lanes -> (1, reps*width)."""
    return v if reps == 1 else jnp.concatenate([v] * reps, axis=1)


# ---------------------------------------------------------------------------
# Pallas kernel (fully fused forward)
# ---------------------------------------------------------------------------
def _make_kernel(meta):
    n = meta[0]["n"]
    n_in = 1 + sum(1 + (2 if m["use_bn"] else 0) for m in meta)

    def kernel(*refs):
        in_refs, out_ref = refs[:n_in], refs[n_in]
        xg = refs[n_in + 1]          # shared gather scratch (f32)
        slabs = refs[n_in + 2:]      # zero-padded input slabs, layers 2..5 (f32)

        # Zero the slabs once so every per-sample H-padding row is a true zero.
        for s in slabs:
            s[...] = jnp.zeros_like(s)

        idx = 1
        src = in_refs[0]             # layer-1 padded input slab (f32)
        for li, m in enumerate(meta):
            r_ref = in_refs[idx]
            idx += 1
            if m["use_bn"]:
                g_ref, b_ref = in_refs[idx], in_refs[idx + 1]
                idx += 2

            k, st, ho, hp = m["k"], m["stride"], m["ho"], m["hp"]
            wo, cout, group = m["wo"], m["cout"], m["group"]
            rows = n * ho

            # ---- Row gather: strided sublane reads replace the old L matmuls.
            #      Pieces are packed side by side (128-aligned lane groups) so
            #      the k kernel taps collapse into ONE wide MXU matmul.
            for b in range(n):              # static unroll over the (small) batch
                for dh in range(k):
                    start = b * hp + dh
                    piece = (src[pl.ds(start, ho, stride=st), :] if st > 1
                             else src[pl.ds(start, ho), :])
                    xg[pl.ds(b * ho, ho), pl.ds(dh * group, group)] = piece
            xcat = xg[pl.ds(0, rows), pl.ds(0, k * group)]

            # ---- Conv2d: one (rows, k*group) @ (k*group, wo*cout) bf16 matmul
            y = jnp.dot(xcat.astype(jnp.bfloat16), r_ref[...],
                        preferred_element_type=jnp.float32)      # f32 accum

            # ---- BatchNorm: training-mode batch stats, two-pass variance.
            if m["use_bn"]:
                inv_cnt = 1.0 / float(rows * wo)                 # N*Ho*Wo
                s1 = jnp.sum(y, axis=0, keepdims=True)           # (1, wo*cout)
                mean_c = _lane_group_sum(s1, wo, cout) * inv_cnt  # (1, cout)
                mean_b = _lane_tile(mean_c, wo)                  # (1, wo*cout)
                d = y - mean_b
                s2 = jnp.sum(d * d, axis=0, keepdims=True)
                var_c = _lane_group_sum(s2, wo, cout) * inv_cnt  # biased var
                a_c = g_ref[...] * jax.lax.rsqrt(var_c + 1e-5)   # gamma * inv_std
                y = d * _lane_tile(a_c, wo) + _lane_tile(b_ref[...], wo)

            # ---- LeakyReLU(0.2): mul + max (cheaper than cmp + select)
            if m["use_act"]:
                y = jnp.maximum(y, 0.2 * y)

            if li == len(meta) - 1:
                # Final conv output is the 1x1 spatial map; avg-pool == identity.
                out_ref[...] = y                                 # (N, 1) f32
            else:
                nxt = meta[li + 1]
                dst = slabs[li]
                width = wo * cout
                for b in range(n):          # pad rows already zeroed above
                    row0 = b * nxt["hp"] + nxt["pad"]
                    val = y[b * ho:(b + 1) * ho, :]
                    if width == dst.shape[1]:
                        dst[pl.ds(row0, ho), :] = val
                    else:
                        dst[pl.ds(row0, ho), pl.ds(0, width)] = val
                src = dst

    return kernel


# ---------------------------------------------------------------------------
# One-time (init) parameter preparation: conv OIHW -> row-stacked Rstack (bf16)
# ---------------------------------------------------------------------------
def _build_rstack(w_oihw, wdim, stride, pad, group):
    """Rstack[dh*group + iw*cin + ci, ow*cout + co] = W[co, ci, dh, dw],
    with iw = stride*ow + dw - pad (out-of-range iw contributes nothing)."""
    wt = np.asarray(w_oihw, np.float32)
    cout, cin, kh, kw = wt.shape
    wo = _out_sz(wdim, kw, stride, pad)
    R = np.zeros((kh * group, wo * cout), np.float32)
    for dh in range(kh):
        for dw in range(kw):
            for ow in range(wo):
                iw = stride * ow + dw - pad
                if 0 <= iw < wdim:
                    R[dh * group + iw * cin: dh * group + (iw + 1) * cin,
                      ow * cout:(ow + 1) * cout] += wt[:, :, dh, dw].T
    return R


def prepare_params(params, h, w):
    """Hoists all weight transposes/reshapes out of the forward path.
    Batch size is NOT baked into the operands (only H/W are)."""
    weights = (params["w1"], params["w2"], params["w3"], params["w4"], params["w5"])
    gammas = (None, params["g2"], params["g3"], params["g4"], None)
    betas = (None, params["b2"], params["b3"], params["b4"], None)

    ops = []
    for i, m in enumerate(_layer_meta(1, h, w)):      # n irrelevant for weights
        R = _build_rstack(weights[i], m["w"], m["stride"], m["pad"], m["group"])
        ops.append(jnp.asarray(R, dtype=jnp.bfloat16))           # bf16 MXU operand
        if m["use_bn"]:
            ops.append(jnp.asarray(np.asarray(gammas[i], np.float32)
                                   .reshape(1, m["cout"])))
            ops.append(jnp.asarray(np.asarray(betas[i], np.float32)
                                   .reshape(1, m["cout"])))
    return tuple(ops)


# ---------------------------------------------------------------------------
# Forward wrapper
# ---------------------------------------------------------------------------
def _vmem_spec(shape):
    zeros = (0,) * len(shape)
    return pl.BlockSpec(shape, lambda i, _z=zeros: _z)


def discriminator_forward(x_nchw, ops):
    n, c, h, w = x_nchw.shape
    meta = _layer_meta(n, h, w)
    m0 = meta[0]

    # NCHW -> NHWC -> (N, H, W*C): zero-pad H by `pad` per sample and pad the
    # lane width up to a 128 multiple, then flatten to a (N*(H+2p), group) slab.
    x3 = jnp.transpose(x_nchw, (0, 2, 3, 1)).astype(jnp.float32).reshape(n, h, w * c)
    x3 = jnp.pad(x3, ((0, 0), (m0["pad"], m0["pad"]), (0, m0["group"] - w * c)))
    x_slab = x3.reshape(n * m0["hp"], m0["group"])

    operands = (x_slab,) + tuple(ops)
    in_specs = [_vmem_spec(op.shape) for op in operands]

    # Scratch: one shared gather buffer + padded input slabs for layers 2..5.
    xg_rows = max(n * m["ho"] for m in meta)
    xg_cols = max(m["k"] * m["group"] for m in meta)
    scratch_shapes = [pltpu.VMEM((xg_rows, xg_cols), jnp.float32)]
    for m in meta[1:]:
        scratch_shapes.append(pltpu.VMEM((n * m["hp"], m["group"]), jnp.float32))

    # Advisory cost estimate for the XLA scheduler.
    flops = sum(2 * (n * m["ho"]) * (m["k"] * m["group"]) * (m["wo"] * m["cout"])
                for m in meta)
    transcendentals = sum(m["cout"] for m in meta if m["use_bn"])
    bytes_accessed = sum(int(np.prod(op.shape)) * op.dtype.itemsize
                         for op in operands) + 4 * n

    out = pl.pallas_call(
        _make_kernel(meta),
        out_shape=jax.ShapeDtypeStruct((n, 1), jnp.float32),
        # Whole batch in one step: training-mode BatchNorm needs full-batch
        # statistics (a "parallel" batch axis would change the semantics).
        grid=(1,),
        in_specs=in_specs,
        out_specs=_vmem_spec((n, 1)),
        scratch_shapes=scratch_shapes,
        compiler_params=pltpu.CompilerParams(
            dimension_semantics=("arbitrary",),
            vmem_limit_bytes=32 * 1024 * 1024),   # headroom if N grows (v5e default: 16 MiB)
        cost_estimate=pl.CostEstimate(flops=int(flops),
                                      transcendentals=int(transcendentals),
                                      bytes_accessed=int(bytes_accessed)),
    )(*operands)
    return out.reshape(n, 1, 1, 1)   # matches PyTorch (N, 1, 1, 1)


# ---------------------------------------------------------------------------
# Parameter init (PyTorch-layout OIHW weights, per-channel BN affine params)
# ---------------------------------------------------------------------------
def init_params(key):
    ks = jax.random.split(key, 8)
    rnd = lambda k, shape: (0.02 * jax.random.normal(k, shape)).astype(jnp.float32)
    return {
        "w1": rnd(ks[0], (DIM, 3, 4, 4)),
        "w2": rnd(ks[1], (DIM * 2, DIM, 4, 4)),
        "w3": rnd(ks[2], (DIM * 4, DIM * 2, 4, 4)),
        "w4": rnd(ks[3], (DIM * 8, DIM * 4, 4, 4)),
        "w5": rnd(ks[4], (1, DIM * 8, 2, 2)),
        "g2": 1.0 + rnd(ks[5], (DIM * 2,)), "b2": jnp.zeros((DIM * 2,), jnp.float32),
        "g3": 1.0 + rnd(ks[6], (DIM * 4,)), "b3": jnp.zeros((DIM * 4,), jnp.float32),
        "g4": 1.0 + rnd(ks[7], (DIM * 8,)), "b4": jnp.zeros((DIM * 8,), jnp.float32),
    }


if __name__ == "__main__":
    key = jax.random.PRNGKey(0)
    k_x, k_p = jax.random.split(key)
    x = jax.random.normal(k_x, (2, 3, 32, 32), dtype=jnp.float32)  # NCHW like PyTorch
    params = init_params(k_p)
    ops = prepare_params(params, h=32, w=32)                       # one-time weight prep

    fwd = jax.jit(discriminator_forward)
    out = jax.block_until_ready(fwd(x, ops))
    assert out.shape == (2, 1, 1, 1), out.shape
    print("KERNEL_OK")
</pallas_src>

<mosaic_0001>
module attributes {stable_mosaic.version = 11 : i64} {
  func.func @kernel(%arg0: i32, %arg1: memref<68x128xf32, #tpu.memory_space<vmem>>, %arg2: memref<512x128xbf16, #tpu.memory_space<vmem>>, %arg3: memref<512x128xbf16, #tpu.memory_space<vmem>>, %arg4: memref<1x16xf32, #tpu.memory_space<vmem>>, %arg5: memref<1x16xf32, #tpu.memory_space<vmem>>, %arg6: memref<512x128xbf16, #tpu.memory_space<vmem>>, %arg7: memref<1x32xf32, #tpu.memory_space<vmem>>, %arg8: memref<1x32xf32, #tpu.memory_space<vmem>>, %arg9: memref<512x128xbf16, #tpu.memory_space<vmem>>, %arg10: memref<1x64xf32, #tpu.memory_space<vmem>>, %arg11: memref<1x64xf32, #tpu.memory_space<vmem>>, %arg12: memref<256x1xbf16, #tpu.memory_space<vmem>>, %arg13: memref<2x1xf32, #tpu.memory_space<vmem>>, %arg14: memref<32x512xf32, #tpu.memory_space<vmem>>, %arg15: memref<36x128xf32, #tpu.memory_space<vmem>>, %arg16: memref<20x128xf32, #tpu.memory_space<vmem>>, %arg17: memref<12x128xf32, #tpu.memory_space<vmem>>, %arg18: memref<4x128xf32, #tpu.memory_space<vmem>>) attributes {dimension_semantics = [#tpu.dimension_semantics<arbitrary>], iteration_bounds = array<i64: 1>, scalar_prefetch = 0 : i64, scratch_operands = 5 : i64, tpu.core_type = #tpu.core_type<tc>, window_params = [{pipeline_mode = #tpu.pipeline_mode<synchronous>, transform_indices = @transform_0, window_bounds = array<i64: 68, 128>}, {pipeline_mode = #tpu.pipeline_mode<synchronous>, transform_indices = @transform_1, window_bounds = array<i64: 512, 128>}, {pipeline_mode = #tpu.pipeline_mode<synchronous>, transform_indices = @transform_2, window_bounds = array<i64: 512, 128>}, {pipeline_mode = #tpu.pipeline_mode<synchronous>, transform_indices = @transform_3, window_bounds = array<i64: 1, 16>}, {pipeline_mode = #tpu.pipeline_mode<synchronous>, transform_indices = @transform_4, window_bounds = array<i64: 1, 16>}, {pipeline_mode = #tpu.pipeline_mode<synchronous>, transform_indices = @transform_5, window_bounds = array<i64: 512, 128>}, {pipeline_mode = #tpu.pipeline_mode<synchronous>, transform_indices = @transform_6, window_bounds = array<i64: 1, 32>}, {pipeline_mode = #tpu.pipeline_mode<synchronous>, transform_indices = @transform_7, window_bounds = array<i64: 1, 32>}, {pipeline_mode = #tpu.pipeline_mode<synchronous>, transform_indices = @transform_8, window_bounds = array<i64: 512, 128>}, {pipeline_mode = #tpu.pipeline_mode<synchronous>, transform_indices = @transform_9, window_bounds = array<i64: 1, 64>}, {pipeline_mode = #tpu.pipeline_mode<synchronous>, transform_indices = @transform_10, window_bounds = array<i64: 1, 64>}, {pipeline_mode = #tpu.pipeline_mode<synchronous>, transform_indices = @transform_11, window_bounds = array<i64: 256, 1>}, {pipeline_mode = #tpu.pipeline_mode<synchronous>, transform_indices = @transform_12, window_bounds = array<i64: 2, 1>}]} {
    %cst = arith.constant 0.000000e+00 : f32
    %0 = vector.broadcast %cst : f32 to vector<36x128xf32>
    %c0 = arith.constant 0 : index
    %c0_0 = arith.constant 0 : index
    %1 = vector.load %arg15[%c0, %c0_0] : memref<36x128xf32, #tpu.memory_space<vmem>>, vector<36x128xf32>
    tpu.vector_store %arg15[%c0, %c0_0], %0 {strides = array<i32>} : memref<36x128xf32, #tpu.memory_space<vmem>>, vector<36x128xf32>,
    %cst_1 = arith.constant 0.000000e+00 : f32
    %2 = vector.broadcast %cst_1 : f32 to vector<20x128xf32>
    %c0_2 = arith.constant 0 : index
    %c0_3 = arith.constant 0 : index
    %3 = vector.load %arg16[%c0_2, %c0_3] : memref<20x128xf32, #tpu.memory_space<vmem>>, vector<20x128xf32>
    tpu.vector_store %arg16[%c0_2, %c0_3], %2 {strides = array<i32>} : memref<20x128xf32, #tpu.memory_space<vmem>>, vector<20x128xf32>,
    %cst_4 = arith.constant 0.000000e+00 : f32
    %4 = vector.broadcast %cst_4 : f32 to vector<12x128xf32>
    %c0_5 = arith.constant 0 : index
    %c0_6 = arith.constant 0 : index
    %5 = vector.load %arg17[%c0_5, %c0_6] : memref<12x128xf32, #tpu.memory_space<vmem>>, vector<12x128xf32>
    tpu.vector_store %arg17[%c0_5, %c0_6], %4 {strides = array<i32>} : memref<12x128xf32, #tpu.memory_space<vmem>>, vector<12x128xf32>,
    %cst_7 = arith.constant 0.000000e+00 : f32
    %6 = vector.broadcast %cst_7 : f32 to vector<4x128xf32>
    %c0_8 = arith.constant 0 : index
    %c0_9 = arith.constant 0 : index
    %7 = vector.load %arg18[%c0_8, %c0_9] : memref<4x128xf32, #tpu.memory_space<vmem>>, vector<4x128xf32>
    tpu.vector_store %arg18[%c0_8, %c0_9], %6 {strides = array<i32>} : memref<4x128xf32, #tpu.memory_space<vmem>>, vector<4x128xf32>,
    %c0_10 = arith.constant 0 : index
    %c0_11 = arith.constant 0 : index
    %8 = tpu.strided_load %arg1[%c0_10, %c0_11] {strides = array<i32: 2, 1>} : memref<68x128xf32, #tpu.memory_space<vmem>>, vector<16x128xf32>
    %c0_12 = arith.constant 0 : index
    %c0_13 = arith.constant 0 : index
    %9 = vector.load %arg14[%c0_12, %c0_13] : memref<32x512xf32, #tpu.memory_space<vmem>>, vector<16x128xf32>
    tpu.vector_store %arg14[%c0_12, %c0_13], %8 {strides = array<i32>} : memref<32x512xf32, #tpu.memory_space<vmem>>, vector<16x128xf32>,
    %c1 = arith.constant 1 : index
    %c0_14 = arith.constant 0 : index
    %10 = tpu.strided_load %arg1[%c1, %c0_14] {strides = array<i32: 2, 1>} : memref<68x128xf32, #tpu.memory_space<vmem>>, vector<16x128xf32>
    %c0_15 = arith.constant 0 : index
    %c128 = arith.constant 128 : index
    %11 = vector.load %arg14[%c0_15, %c128] : memref<32x512xf32, #tpu.memory_space<vmem>>, vector<16x128xf32>
    tpu.vector_store %arg14[%c0_15, %c128], %10 {strides = array<i32>} : memref<32x512xf32, #tpu.memory_space<vmem>>, vector<16x128xf32>,
    %c2 = arith.constant 2 : index
    %c0_16 = arith.constant 0 : index
    %12 = tpu.strided_load %arg1[%c2, %c0_16] {strides = array<i32: 2, 1>} : memref<68x128xf32, #tpu.memory_space<vmem>>, vector<16x128xf32>
    %c0_17 = arith.constant 0 : index
    %c256 = arith.constant 256 : index
    %13 = vector.load %arg14[%c0_17, %c256] : memref<32x512xf32, #tpu.memory_space<vmem>>, vector<16x128xf32>
    tpu.vector_store %arg14[%c0_17, %c256], %12 {strides = array<i32>} : memref<32x512xf32, #tpu.memory_space<vmem>>, vector<16x128xf32>,
    %c3 = arith.constant 3 : index
    %c0_18 = arith.constant 0 : index
    %14 = tpu.strided_load %arg1[%c3, %c0_18] {strides = array<i32: 2, 1>} : memref<68x128xf32, #tpu.memory_space<vmem>>, vector<16x128xf32>
    %c0_19 = arith.constant 0 : index
    %c384 = arith.constant 384 : index
    %15 = vector.load %arg14[%c0_19, %c384] : memref<32x512xf32, #tpu.memory_space<vmem>>, vector<16x128xf32>
    tpu.vector_store %arg14[%c0_19, %c384], %14 {strides = array<i32>} : memref<32x512xf32, #tpu.memory_space<vmem>>, vector<16x128xf32>,
    %c34 = arith.constant 34 : index
    %c0_20 = arith.constant 0 : index
    %16 = tpu.strided_load %arg1[%c34, %c0_20] {strides = array<i32: 2, 1>} : memref<68x128xf32, #tpu.memory_space<vmem>>, vector<16x128xf32>
    %c16 = arith.constant 16 : index
    %c0_21 = arith.constant 0 : index
    %17 = vector.load %arg14[%c16, %c0_21] : memref<32x512xf32, #tpu.memory_space<vmem>>, vector<16x128xf32>
    tpu.vector_store %arg14[%c16, %c0_21], %16 {strides = array<i32>} : memref<32x512xf32, #tpu.memory_space<vmem>>, vector<16x128xf32>,
    %c35 = arith.constant 35 : index
    %c0_22 = arith.constant 0 : index
    %18 = tpu.strided_load %arg1[%c35, %c0_22] {strides = array<i32: 2, 1>} : memref<68x128xf32, #tpu.memory_space<vmem>>, vector<16x128xf32>
    %c16_23 = arith.constant 16 : index
    %c128_24 = arith.constant 128 : index
    %19 = vector.load %arg14[%c16_23, %c128_24] : memref<32x512xf32, #tpu.memory_space<vmem>>, vector<16x128xf32>
    tpu.vector_store %arg14[%c16_23, %c128_24], %18 {strides = array<i32>} : memref<32x512xf32, #tpu.memory_space<vmem>>, vector<16x128xf32>,
    %c36 = arith.constant 36 : index
    %c0_25 = arith.constant 0 : index
    %20 = tpu.strided_load %arg1[%c36, %c0_25] {strides = array<i32: 2, 1>} : memref<68x128xf32, #tpu.memory_space<vmem>>, vector<16x128xf32>
    %c16_26 = arith.constant 16 : index
    %c256_27 = arith.constant 256 : index
    %21 = vector.load %arg14[%c16_26, %c256_27] : memref<32x512xf32, #tpu.memory_space<vmem>>, vector<16x128xf32>
    tpu.vector_store %arg14[%c16_26, %c256_27], %20 {strides = array<i32>} : memref<32x512xf32, #tpu.memory_space<vmem>>, vector<16x128xf32>,
    %c37 = arith.constant 37 : index
    %c0_28 = arith.constant 0 : index
    %22 = tpu.strided_load %arg1[%c37, %c0_28] {strides = array<i32: 2, 1>} : memref<68x128xf32, #tpu.memory_space<vmem>>, vector<16x128xf32>
    %c16_29 = arith.constant 16 : index
    %c384_30 = arith.constant 384 : index
    %23 = vector.load %arg14[%c16_29, %c384_30] : memref<32x512xf32, #tpu.memory_space<vmem>>, vector<16x128xf32>
    tpu.vector_store %arg14[%c16_29, %c384_30], %22 {strides = array<i32>} : memref<32x512xf32, #tpu.memory_space<vmem>>, vector<16x128xf32>,
    %c0_31 = arith.constant 0 : index
    %c0_32 = arith.constant 0 : index
    %24 = vector.load %arg14[%c0_31, %c0_32] : memref<32x512xf32, #tpu.memory_space<vmem>>, vector<32x512xf32>
    %25 = arith.truncf %24 : vector<32x512xf32> to vector<32x512xbf16>
    %c0_33 = arith.constant 0 : index
    %c0_34 = arith.constant 0 : index
    %26 = vector.load %arg2[%c0_33, %c0_34] : memref<512x128xbf16, #tpu.memory_space<vmem>>, vector<512x128xbf16>
    %cst_35 = arith.constant dense<0.000000e+00> : vector<32x128xf32>
    %27 = tpu.matmul %25, %26, %cst_35 {dimension_numbers = #tpu.dot_dimension_numbers<[1], [0], [0], [1], [0, 0, 1, 1], [], []>} : vector<32x512xbf16>, vector<512x128xbf16>, vector<32x128xf32> -> vector<32x128xf32>
    %cst_36 = arith.constant 2.000000e-01 : f32
    %28 = vector.broadcast %cst_36 : f32 to vector<32x128xf32>
    %29 = arith.mulf %28, %27 : vector<32x128xf32>
    %30 = arith.maximumf %27, %29 : vector<32x128xf32>
    %31 = vector.extract_strided_slice %30 {offsets = [0, 0], sizes = [16, 128], strides = [1, 1]} : vector<32x128xf32> to vector<16x128xf32>
    %c1_37 = arith.constant 1 : index
    %c0_38 = arith.constant 0 : index
    %32 = vector.load %arg15[%c1_37, %c0_38] : memref<36x128xf32, #tpu.memory_space<vmem>>, vector<16x128xf32>
    tpu.vector_store %arg15[%c1_37, %c0_38], %31 {strides = array<i32>} : memref<36x128xf32, #tpu.memory_space<vmem>>, vector<16x128xf32>,
    %33 = vector.extract_strided_slice %30 {offsets = [16, 0], sizes = [16, 128], strides = [1, 1]} : vector<32x128xf32> to vector<16x128xf32>
    %c19 = arith.constant 19 : index
    %c0_39 = arith.constant 0 : index
    %34 = vector.load %arg15[%c19, %c0_39] : memref<36x128xf32, #tpu.memory_space<vmem>>, vector<16x128xf32>
    tpu.vector_store %arg15[%c19, %c0_39], %33 {strides = array<i32>} : memref<36x128xf32, #tpu.memory_space<vmem>>, vector<16x128xf32>,
    %c0_40 = arith.constant 0 : index
    %c0_41 = arith.constant 0 : index
    %35 = tpu.strided_load %arg15[%c0_40, %c0_41] {strides = array<i32: 2, 1>} : memref<36x128xf32, #tpu.memory_space<vmem>>, vector<8x128xf32>
    %c0_42 = arith.constant 0 : index
    %c0_43 = arith.constant 0 : index
    %36 = vector.load %arg14[%c0_42, %c0_43] : memref<32x512xf32, #tpu.memory_space<vmem>>, vector<8x128xf32>
    tpu.vector_store %arg14[%c0_42, %c0_43], %35 {strides = array<i32>} : memref<32x512xf32, #tpu.memory_space<vmem>>, vector<8x128xf32>,
    %c1_44 = arith.constant 1 : index
    %c0_45 = arith.constant 0 : index
    %37 = tpu.strided_load %arg15[%c1_44, %c0_45] {strides = array<i32: 2, 1>} : memref<36x128xf32, #tpu.memory_space<vmem>>, vector<8x128xf32>
    %c0_46 = arith.constant 0 : index
    %c128_47 = arith.constant 128 : index
    %38 = vector.load %arg14[%c0_46, %c128_47] : memref<32x512xf32, #tpu.memory_space<vmem>>, vector<8x128xf32>
    tpu.vector_store %arg14[%c0_46, %c128_47], %37 {strides = array<i32>} : memref<32x512xf32, #tpu.memory_space<vmem>>, vector<8x128xf32>,
    %c2_48 = arith.constant 2 : index
    %c0_49 = arith.constant 0 : index
    %39 = tpu.strided_load %arg15[%c2_48, %c0_49] {strides = array<i32: 2, 1>} : memref<36x128xf32, #tpu.memory_space<vmem>>, vector<8x128xf32>
    %c0_50 = arith.constant 0 : index
    %c256_51 = arith.constant 256 : index
    %40 = vector.load %arg14[%c0_50, %c256_51] : memref<32x512xf32, #tpu.memory_space<vmem>>, vector<8x128xf32>
    tpu.vector_store %arg14[%c0_50, %c256_51], %39 {strides = array<i32>} : memref<32x512xf32, #tpu.memory_space<vmem>>, vector<8x128xf32>,
    %c3_52 = arith.constant 3 : index
    %c0_53 = arith.constant 0 : index
    %41 = tpu.strided_load %arg15[%c3_52, %c0_53] {strides = array<i32: 2, 1>} : memref<36x128xf32, #tpu.memory_space<vmem>>, vector<8x128xf32>
    %c0_54 = arith.constant 0 : index
    %c384_55 = arith.constant 384 : index
    %42 = vector.load %arg14[%c0_54, %c384_55] : memref<32x512xf32, #tpu.memory_space<vmem>>, vector<8x128xf32>
    tpu.vector_store %arg14[%c0_54, %c384_55], %41 {strides = array<i32>} : memref<32x512xf32, #tpu.memory_space<vmem>>, vector<8x128xf32>,
    %c18 = arith.constant 18 : index
    %c0_56 = arith.constant 0 : index
    %43 = tpu.strided_load %arg15[%c18, %c0_56] {strides = array<i32: 2, 1>} : memref<36x128xf32, #tpu.memory_space<vmem>>, vector<8x128xf32>
    %c8 = arith.constant 8 : index
    %c0_57 = arith.constant 0 : index
    %44 = vector.load %arg14[%c8, %c0_57] : memref<32x512xf32, #tpu.memory_space<vmem>>, vector<8x128xf32>
    tpu.vector_store %arg14[%c8, %c0_57], %43 {strides = array<i32>} : memref<32x512xf32, #tpu.memory_space<vmem>>, vector<8x128xf32>,
    %c19_58 = arith.constant 19 : index
    %c0_59 = arith.constant 0 : index
    %45 = tpu.strided_load %arg15[%c19_58, %c0_59] {strides = array<i32: 2, 1>} : memref<36x128xf32, #tpu.memory_space<vmem>>, vector<8x128xf32>
    %c8_60 = arith.constant 8 : index
    %c128_61 = arith.constant 128 : index
    %46 = vector.load %arg14[%c8_60, %c128_61] : memref<32x512xf32, #tpu.memory_space<vmem>>, vector<8x128xf32>
    tpu.vector_store %arg14[%c8_60, %c128_61], %45 {strides = array<i32>} : memref<32x512xf32, #tpu.memory_space<vmem>>, vector<8x128xf32>,
    %c20 = arith.constant 20 : index
    %c0_62 = arith.constant 0 : index
    %47 = tpu.strided_load %arg15[%c20, %c0_62] {strides = array<i32: 2, 1>} : memref<36x128xf32, #tpu.memory_space<vmem>>, vector<8x128xf32>
    %c8_63 = arith.constant 8 : index
    %c256_64 = arith.constant 256 : index
    %48 = vector.load %arg14[%c8_63, %c256_64] : memref<32x512xf32, #tpu.memory_space<vmem>>, vector<8x128xf32>
    tpu.vector_store %arg14[%c8_63, %c256_64], %47 {strides = array<i32>} : memref<32x512xf32, #tpu.memory_space<vmem>>, vector<8x128xf32>,
    %c21 = arith.constant 21 : index
    %c0_65 = arith.constant 0 : index
    %49 = tpu.strided_load %arg15[%c21, %c0_65] {strides = array<i32: 2, 1>} : memref<36x128xf32, #tpu.memory_space<vmem>>, vector<8x128xf32>
    %c8_66 = arith.constant 8 : index
    %c384_67 = arith.constant 384 : index
    %50 = vector.load %arg14[%c8_66, %c384_67] : memref<32x512xf32, #tpu.memory_space<vmem>>, vector<8x128xf32>
    tpu.vector_store %arg14[%c8_66, %c384_67], %49 {strides = array<i32>} : memref<32x512xf32, #tpu.memory_space<vmem>>, vector<8x128xf32>,
    %c0_68 = arith.constant 0 : index
    %c0_69 = arith.constant 0 : index
    %51 = vector.load %arg14[%c0_68, %c0_69] : memref<32x512xf32, #tpu.memory_space<vmem>>, vector<16x512xf32>
    %52 = arith.truncf %51 : vector<16x512xf32> to vector<16x512xbf16>
    %c0_70 = arith.constant 0 : index
    %c0_71 = arith.constant 0 : index
    %53 = vector.load %arg3[%c0_70, %c0_71] : memref<512x128xbf16, #tpu.memory_space<vmem>>, vector<512x128xbf16>
    %cst_72 = arith.constant dense<0.000000e+00> : vector<16x128xf32>
    %54 = tpu.matmul %52, %53, %cst_72 {dimension_numbers = #tpu.dot_dimension_numbers<[1], [0], [0], [1], [0, 0, 1, 1], [], []>} : vector<16x512xbf16>, vector<512x128xbf16>, vector<16x128xf32> -> vector<16x128xf32>
    %cst_73 = arith.constant dense<0.000000e+00> : vector<128xf32>
    %55 = vector.multi_reduction <add>, %54, %cst_73 [0] : vector<16x128xf32> to vector<128xf32>
    %56 = vector.shape_cast %55 : vector<128xf32> to vector<1x128xf32>
    %57 = vector.extract_strided_slice %56 {offsets = [0, 0], sizes = [1, 16], strides = [1, 1]} : vector<1x128xf32> to vector<1x16xf32>
    %58 = vector.extract_strided_slice %56 {offsets = [0, 16], sizes = [1, 16], strides = [1, 1]} : vector<1x128xf32> to vector<1x16xf32>
    %59 = arith.addf %57, %58 : vector<1x16xf32>
    %60 = vector.extract_strided_slice %56 {offsets = [0, 32], sizes = [1, 16], strides = [1, 1]} : vector<1x128xf32> to vector<1x16xf32>
    %61 = arith.addf %59, %60 : vector<1x16xf32>
    %62 = vector.extract_strided_slice %56 {offsets = [0, 48], sizes = [1, 16], strides = [1, 1]} : vector<1x128xf32> to vector<1x16xf32>
    %63 = arith.addf %61, %62 : vector<1x16xf32>
    %64 = vector.extract_strided_slice %56 {offsets = [0, 64], sizes = [1, 16], strides = [1, 1]} : vector<1x128xf32> to vector<1x16xf32>
    %65 = arith.addf %63, %64 : vector<1x16xf32>
    %66 = vector.extract_strided_slice %56 {offsets = [0, 80], sizes = [1, 16], strides = [1, 1]} : vector<1x128xf32> to vector<1x16xf32>
    %67 = arith.addf %65, %66 : vector<1x16xf32>
    %68 = vector.extract_strided_slice %56 {offsets = [0, 96], sizes = [1, 16], strides = [1, 1]} : vector<1x128xf32> to vector<1x16xf32>
    %69 = arith.addf %67, %68 : vector<1x16xf32>
    %70 = vector.extract_strided_slice %56 {offsets = [0, 112], sizes = [1, 16], strides = [1, 1]} : vector<1x128xf32> to vector<1x16xf32>
    %71 = arith.addf %69, %70 : vector<1x16xf32>
    %cst_74 = arith.constant 7.812500e-03 : f32
    %72 = vector.broadcast %cst_74 : f32 to vector<1x16xf32>
    %73 = arith.mulf %71, %72 : vector<1x16xf32>
    %74 = tpu.concatenate %73, %73, %73, %73, %73, %73, %73, %73 in 1 : vector<1x16xf32>, vector<1x16xf32>, vector<1x16xf32>, vector<1x16xf32>, vector<1x16xf32>, vector<1x16xf32>, vector<1x16xf32>, vector<1x16xf32> -> vector<1x128xf32>
    %75 = vector.broadcast %74 : vector<1x128xf32> to vector<16x128xf32>
    %76 = arith.subf %54, %75 : vector<16x128xf32>
    %77 = arith.mulf %76, %76 : vector<16x128xf32>
    %cst_75 = arith.constant dense<0.000000e+00> : vector<128xf32>
    %78 = vector.multi_reduction <add>, %77, %cst_75 [0] : vector<16x128xf32> to vector<128xf32>
    %79 = vector.shape_cast %78 : vector<128xf32> to vector<1x128xf32>
    %80 = vector.extract_strided_slice %79 {offsets = [0, 0], sizes = [1, 16], strides = [1, 1]} : vector<1x128xf32> to vector<1x16xf32>
    %81 = vector.extract_strided_slice %79 {offsets = [0, 16], sizes = [1, 16], strides = [1, 1]} : vector<1x128xf32> to vector<1x16xf32>
    %82 = arith.addf %80, %81 : vector<1x16xf32>
    %83 = vector.extract_strided_slice %79 {offsets = [0, 32], sizes = [1, 16], strides = [1, 1]} : vector<1x128xf32> to vector<1x16xf32>
    %84 = arith.addf %82, %83 : vector<1x16xf32>
    %85 = vector.extract_strided_slice %79 {offsets = [0, 48], sizes = [1, 16], strides = [1, 1]} : vector<1x128xf32> to vector<1x16xf32>
    %86 = arith.addf %84, %85 : vector<1x16xf32>
    %87 = vector.extract_strided_slice %79 {offsets = [0, 64], sizes = [1, 16], strides = [1, 1]} : vector<1x128xf32> to vector<1x16xf32>
    %88 = arith.addf %86, %87 : vector<1x16xf32>
    %89 = vector.extract_strided_slice %79 {offsets = [0, 80], sizes = [1, 16], strides = [1, 1]} : vector<1x128xf32> to vector<1x16xf32>
    %90 = arith.addf %88, %89 : vector<1x16xf32>
    %91 = vector.extract_strided_slice %79 {offsets = [0, 96], sizes = [1, 16], strides = [1, 1]} : vector<1x128xf32> to vector<1x16xf32>
    %92 = arith.addf %90, %91 : vector<1x16xf32>
    %93 = vector.extract_strided_slice %79 {offsets = [0, 112], sizes = [1, 16], strides = [1, 1]} : vector<1x128xf32> to vector<1x16xf32>
    %94 = arith.addf %92, %93 : vector<1x16xf32>
    %cst_76 = arith.constant 7.812500e-03 : f32
    %95 = vector.broadcast %cst_76 : f32 to vector<1x16xf32>
    %96 = arith.mulf %94, %95 : vector<1x16xf32>
    %c0_77 = arith.constant 0 : index
    %c0_78 = arith.constant 0 : index
    %97 = vector.load %arg4[%c0_77, %c0_78] : memref<1x16xf32, #tpu.memory_space<vmem>>, vector<1x16xf32>
    %cst_79 = arith.constant 9.99999974E-6 : f32
    %98 = vector.broadcast %cst_79 : f32 to vector<1x16xf32>
    %99 = arith.addf %96, %98 : vector<1x16xf32>
    %100 = math.rsqrt %99 : vector<1x16xf32>
    %101 = arith.mulf %97, %100 : vector<1x16xf32>
    %102 = tpu.concatenate %101, %101, %101, %101, %101, %101, %101, %101 in 1 : vector<1x16xf32>, vector<1x16xf32>, vector<1x16xf32>, vector<1x16xf32>, vector<1x16xf32>, vector<1x16xf32>, vector<1x16xf32>, vector<1x16xf32> -> vector<1x128xf32>
    %103 = vector.broadcast %102 : vector<1x128xf32> to vector<16x128xf32>
    %104 = arith.mulf %76, %103 : vector<16x128xf32>
    %c0_80 = arith.constant 0 : index
    %c0_81 = arith.constant 0 : index
    %105 = vector.load %arg5[%c0_80, %c0_81] : memref<1x16xf32, #tpu.memory_space<vmem>>, vector<1x16xf32>
    %106 = tpu.concatenate %105, %105, %105, %105, %105, %105, %105, %105 in 1 : vector<1x16xf32>, vector<1x16xf32>, vector<1x16xf32>, vector<1x16xf32>, vector<1x16xf32>, vector<1x16xf32>, vector<1x16xf32>, vector<1x16xf32> -> vector<1x128xf32>
    %107 = vector.broadcast %106 : vector<1x128xf32> to vector<16x128xf32>
    %108 = arith.addf %104, %107 : vector<16x128xf32>
    %cst_82 = arith.constant 2.000000e-01 : f32
    %109 = vector.broadcast %cst_82 : f32 to vector<16x128xf32>
    %110 = arith.mulf %109, %108 : vector<16x128xf32>
    %111 = arith.maximumf %108, %110 : vector<16x128xf32>
    %112 = vector.extract_strided_slice %111 {offsets = [0, 0], sizes = [8, 128], strides = [1, 1]} : vector<16x128xf32> to vector<8x128xf32>
    %c1_83 = arith.constant 1 : index
    %c0_84 = arith.constant 0 : index
    %113 = vector.load %arg16[%c1_83, %c0_84] : memref<20x128xf32, #tpu.memory_space<vmem>>, vector<8x128xf32>
    tpu.vector_store %arg16[%c1_83, %c0_84], %112 {strides = array<i32>} : memref<20x128xf32, #tpu.memory_space<vmem>>, vector<8x128xf32>,
    %114 = vector.extract_strided_slice %111 {offsets = [8, 0], sizes = [8, 128], strides = [1, 1]} : vector<16x128xf32> to vector<8x128xf32>
    %c11 = arith.constant 11 : index
    %c0_85 = arith.constant 0 : index
    %115 = vector.load %arg16[%c11, %c0_85] : memref<20x128xf32, #tpu.memory_space<vmem>>, vector<8x128xf32>
    tpu.vector_store %arg16[%c11, %c0_85], %114 {strides = array<i32>} : memref<20x128xf32, #tpu.memory_space<vmem>>, vector<8x128xf32>,
    %c0_86 = arith.constant 0 : index
    %c0_87 = arith.constant 0 : index
    %116 = tpu.strided_load %arg16[%c0_86, %c0_87] {strides = array<i32: 2, 1>} : memref<20x128xf32, #tpu.memory_space<vmem>>, vector<4x128xf32>
    %c0_88 = arith.constant 0 : index
    %c0_89 = arith.constant 0 : index
    %117 = vector.load %arg14[%c0_88, %c0_89] : memref<32x512xf32, #tpu.memory_space<vmem>>, vector<4x128xf32>
    tpu.vector_store %arg14[%c0_88, %c0_89], %116 {strides = array<i32>} : memref<32x512xf32, #tpu.memory_space<vmem>>, vector<4x128xf32>,
    %c1_90 = arith.constant 1 : index
    %c0_91 = arith.constant 0 : index
    %118 = tpu.strided_load %arg16[%c1_90, %c0_91] {strides = array<i32: 2, 1>} : memref<20x128xf32, #tpu.memory_space<vmem>>, vector<4x128xf32>
    %c0_92 = arith.constant 0 : index
    %c128_93 = arith.constant 128 : index
    %119 = vector.load %arg14[%c0_92, %c128_93] : memref<32x512xf32, #tpu.memory_space<vmem>>, vector<4x128xf32>
    tpu.vector_store %arg14[%c0_92, %c128_93], %118 {strides = array<i32>} : memref<32x512xf32, #tpu.memory_space<vmem>>, vector<4x128xf32>,
    %c2_94 = arith.constant 2 : index
    %c0_95 = arith.constant 0 : index
    %120 = tpu.strided_load %arg16[%c2_94, %c0_95] {strides = array<i32: 2, 1>} : memref<20x128xf32, #tpu.memory_space<vmem>>, vector<4x128xf32>
    %c0_96 = arith.constant 0 : index
    %c256_97 = arith.constant 256 : index
    %121 = vector.load %arg14[%c0_96, %c256_97] : memref<32x512xf32, #tpu.memory_space<vmem>>, vector<4x128xf32>
    tpu.vector_store %arg14[%c0_96, %c256_97], %120 {strides = array<i32>} : memref<32x512xf32, #tpu.memory_space<vmem>>, vector<4x128xf32>,
    %c3_98 = arith.constant 3 : index
    %c0_99 = arith.constant 0 : index
    %122 = tpu.strided_load %arg16[%c3_98, %c0_99] {strides = array<i32: 2, 1>} : memref<20x128xf32, #tpu.memory_space<vmem>>, vector<4x128xf32>
    %c0_100 = arith.constant 0 : index
    %c384_101 = arith.constant 384 : index
    %123 = vector.load %arg14[%c0_100, %c384_101] : memref<32x512xf32, #tpu.memory_space<vmem>>, vector<4x128xf32>
    tpu.vector_store %arg14[%c0_100, %c384_101], %122 {strides = array<i32>} : memref<32x512xf32, #tpu.memory_space<vmem>>, vector<4x128xf32>,
    %c10 = arith.constant 10 : index
    %c0_102 = arith.constant 0 : index
    %124 = tpu.strided_load %arg16[%c10, %c0_102] {strides = array<i32: 2, 1>} : memref<20x128xf32, #tpu.memory_space<vmem>>, vector<4x128xf32>
    %c4 = arith.constant 4 : index
    %c0_103 = arith.constant 0 : index
    %125 = vector.load %arg14[%c4, %c0_103] : memref<32x512xf32, #tpu.memory_space<vmem>>, vector<4x128xf32>
    tpu.vector_store %arg14[%c4, %c0_103], %124 {strides = array<i32>} : memref<32x512xf32, #tpu.memory_space<vmem>>, vector<4x128xf32>,
    %c11_104 = arith.constant 11 : index
    %c0_105 = arith.constant 0 : index
    %126 = tpu.strided_load %arg16[%c11_104, %c0_105] {strides = array<i32: 2, 1>} : memref<20x128xf32, #tpu.memory_space<vmem>>, vector<4x128xf32>
    %c4_106 = arith.constant 4 : index
    %c128_107 = arith.constant 128 : index
    %127 = vector.load %arg14[%c4_106, %c128_107] : memref<32x512xf32, #tpu.memory_space<vmem>>, vector<4x128xf32>
    tpu.vector_store %arg14[%c4_106, %c128_107], %126 {strides = array<i32>} : memref<32x512xf32, #tpu.memory_space<vmem>>, vector<4x128xf32>,
    %c12 = arith.constant 12 : index
    %c0_108 = arith.constant 0 : index
    %128 = tpu.strided_load %arg16[%c12, %c0_108] {strides = array<i32: 2, 1>} : memref<20x128xf32, #tpu.memory_space<vmem>>, vector<4x128xf32>
    %c4_109 = arith.constant 4 : index
    %c256_110 = arith.constant 256 : index
    %129 = vector.load %arg14[%c4_109, %c256_110] : memref<32x512xf32, #tpu.memory_space<vmem>>, vector<4x128xf32>
    tpu.vector_store %arg14[%c4_109, %c256_110], %128 {strides = array<i32>} : memref<32x512xf32, #tpu.memory_space<vmem>>, vector<4x128xf32>,
    %c13 = arith.constant 13 : index
    %c0_111 = arith.constant 0 : index
    %130 = tpu.strided_load %arg16[%c13, %c0_111] {strides = array<i32: 2, 1>} : memref<20x128xf32, #tpu.memory_space<vmem>>, vector<4x128xf32>
    %c4_112 = arith.constant 4 : index
    %c384_113 = arith.constant 384 : index
    %131 = vector.load %arg14[%c4_112, %c384_113] : memref<32x512xf32, #tpu.memory_space<vmem>>, vector<4x128xf32>
    tpu.vector_store %arg14[%c4_112, %c384_113], %130 {strides = array<i32>} : memref<32x512xf32, #tpu.memory_space<vmem>>, vector<4x128xf32>,
    %c0_114 = arith.constant 0 : index
    %c0_115 = arith.constant 0 : index
    %132 = vector.load %arg14[%c0_114, %c0_115] : memref<32x512xf32, #tpu.memory_space<vmem>>, vector<8x512xf32>
    %133 = arith.truncf %132 : vector<8x512xf32> to vector<8x512xbf16>
    %c0_116 = arith.constant 0 : index
    %c0_117 = arith.constant 0 : index
    %134 = vector.load %arg6[%c0_116, %c0_117] : memref<512x128xbf16, #tpu.memory_space<vmem>>, vector<512x128xbf16>
    %cst_118 = arith.constant dense<0.000000e+00> : vector<8x128xf32>
    %135 = tpu.matmul %133, %134, %cst_118 {dimension_numbers = #tpu.dot_dimension_numbers<[1], [0], [0], [1], [0, 0, 1, 1], [], []>} : vector<8x512xbf16>, vector<512x128xbf16>, vector<8x128xf32> -> vector<8x128xf32>
    %cst_119 = arith.constant dense<0.000000e+00> : vector<128xf32>
    %136 = vector.multi_reduction <add>, %135, %cst_119 [0] : vector<8x128xf32> to vector<128xf32>
    %137 = vector.shape_cast %136 : vector<128xf32> to vector<1x128xf32>
    %138 = vector.extract_strided_slice %137 {offsets = [0, 0], sizes = [1, 32], strides = [1, 1]} : vector<1x128xf32> to vector<1x32xf32>
    %139 = vector.extract_strided_slice %137 {offsets = [0, 32], sizes = [1, 32], strides = [1, 1]} : vector<1x128xf32> to vector<1x32xf32>
    %140 = arith.addf %138, %139 : vector<1x32xf32>
    %141 = vector.extract_strided_slice %137 {offsets = [0, 64], sizes = [1, 32], strides = [1, 1]} : vector<1x128xf32> to vector<1x32xf32>
    %142 = arith.addf %140, %141 : vector<1x32xf32>
    %143 = vector.extract_strided_slice %137 {offsets = [0, 96], sizes = [1, 32], strides = [1, 1]} : vector<1x128xf32> to vector<1x32xf32>
    %144 = arith.addf %142, %143 : vector<1x32xf32>
    %cst_120 = arith.constant 3.125000e-02 : f32
    %145 = vector.broadcast %cst_120 : f32 to vector<1x32xf32>
    %146 = arith.mulf %144, %145 : vector<1x32xf32>
    %147 = tpu.concatenate %146, %146, %146, %146 in 1 : vector<1x32xf32>, vector<1x32xf32>, vector<1x32xf32>, vector<1x32xf32> -> vector<1x128xf32>
    %148 = vector.broadcast %147 : vector<1x128xf32> to vector<8x128xf32>
    %149 = arith.subf %135, %148 : vector<8x128xf32>
    %150 = arith.mulf %149, %149 : vector<8x128xf32>
    %cst_121 = arith.constant dense<0.000000e+00> : vector<128xf32>
    %151 = vector.multi_reduction <add>, %150, %cst_121 [0] : vector<8x128xf32> to vector<128xf32>
    %152 = vector.shape_cast %151 : vector<128xf32> to vector<1x128xf32>
    %153 = vector.extract_strided_slice %152 {offsets = [0, 0], sizes = [1, 32], strides = [1, 1]} : vector<1x128xf32> to vector<1x32xf32>
    %154 = vector.extract_strided_slice %152 {offsets = [0, 32], sizes = [1, 32], strides = [1, 1]} : vector<1x128xf32> to vector<1x32xf32>
    %155 = arith.addf %153, %154 : vector<1x32xf32>
    %156 = vector.extract_strided_slice %152 {offsets = [0, 64], sizes = [1, 32], strides = [1, 1]} : vector<1x128xf32> to vector<1x32xf32>
    %157 = arith.addf %155, %156 : vector<1x32xf32>
    %158 = vector.extract_strided_slice %152 {offsets = [0, 96], sizes = [1, 32], strides = [1, 1]} : vector<1x128xf32> to vector<1x32xf32>
    %159 = arith.addf %157, %158 : vector<1x32xf32>
    %cst_122 = arith.constant 3.125000e-02 : f32
    %160 = vector.broadcast %cst_122 : f32 to vector<1x32xf32>
    %161 = arith.mulf %159, %160 : vector<1x32xf32>
    %c0_123 = arith.constant 0 : index
    %c0_124 = arith.constant 0 : index
    %162 = vector.load %arg7[%c0_123, %c0_124] : memref<1x32xf32, #tpu.memory_space<vmem>>, vector<1x32xf32>
    %cst_125 = arith.constant 9.99999974E-6 : f32
    %163 = vector.broadcast %cst_125 : f32 to vector<1x32xf32>
    %164 = arith.addf %161, %163 : vector<1x32xf32>
    %165 = math.rsqrt %164 : vector<1x32xf32>
    %166 = arith.mulf %162, %165 : vector<1x32xf32>
    %167 = tpu.concatenate %166, %166, %166, %166 in 1 : vector<1x32xf32>, vector<1x32xf32>, vector<1x32xf32>, vector<1x32xf32> -> vector<1x128xf32>
    %168 = vector.broadcast %167 : vector<1x128xf32> to vector<8x128xf32>
    %169 = arith.mulf %149, %168 : vector<8x128xf32>
    %c0_126 = arith.constant 0 : index
    %c0_127 = arith.constant 0 : index
    %170 = vector.load %arg8[%c0_126, %c0_127] : memref<1x32xf32, #tpu.memory_space<vmem>>, vector<1x32xf32>
    %171 = tpu.concatenate %170, %170, %170, %170 in 1 : vector<1x32xf32>, vector<1x32xf32>, vector<1x32xf32>, vector<1x32xf32> -> vector<1x128xf32>
    %172 = vector.broadcast %171 : vector<1x128xf32> to vector<8x128xf32>
    %173 = arith.addf %169, %172 : vector<8x128xf32>
    %cst_128 = arith.constant 2.000000e-01 : f32
    %174 = vector.broadcast %cst_128 : f32 to vector<8x128xf32>
    %175 = arith.mulf %174, %173 : vector<8x128xf32>
    %176 = arith.maximumf %173, %175 : vector<8x128xf32>
    %177 = vector.extract_strided_slice %176 {offsets = [0, 0], sizes = [4, 128], strides = [1, 1]} : vector<8x128xf32> to vector<4x128xf32>
    %c1_129 = arith.constant 1 : index
    %c0_130 = arith.constant 0 : index
    %178 = vector.load %arg17[%c1_129, %c0_130] : memref<12x128xf32, #tpu.memory_space<vmem>>, vector<4x128xf32>
    tpu.vector_store %arg17[%c1_129, %c0_130], %177 {strides = array<i32>} : memref<12x128xf32, #tpu.memory_space<vmem>>, vector<4x128xf32>,
    %179 = vector.extract_strided_slice %176 {offsets = [4, 0], sizes = [4, 128], strides = [1, 1]} : vector<8x128xf32> to vector<4x128xf32>
    %c7 = arith.constant 7 : index
    %c0_131 = arith.constant 0 : index
    %180 = vector.load %arg17[%c7, %c0_131] : memref<12x128xf32, #tpu.memory_space<vmem>>, vector<4x128xf32>
    tpu.vector_store %arg17[%c7, %c0_131], %179 {strides = array<i32>} : memref<12x128xf32, #tpu.memory_space<vmem>>, vector<4x128xf32>,
    %c0_132 = arith.constant 0 : index
    %c0_133 = arith.constant 0 : index
    %181 = tpu.strided_load %arg17[%c0_132, %c0_133] {strides = array<i32: 2, 1>} : memref<12x128xf32, #tpu.memory_space<vmem>>, vector<2x128xf32>
    %c0_134 = arith.constant 0 : index
    %c0_135 = arith.constant 0 : index
    %182 = vector.load %arg14[%c0_134, %c0_135] : memref<32x512xf32, #tpu.memory_space<vmem>>, vector<2x128xf32>
    tpu.vector_store %arg14[%c0_134, %c0_135], %181 {strides = array<i32>} : memref<32x512xf32, #tpu.memory_space<vmem>>, vector<2x128xf32>,
    %c1_136 = arith.constant 1 : index
    %c0_137 = arith.constant 0 : index
    %183 = tpu.strided_load %arg17[%c1_136, %c0_137] {strides = array<i32: 2, 1>} : memref<12x128xf32, #tpu.memory_space<vmem>>, vector<2x128xf32>
    %c0_138 = arith.constant 0 : index
    %c128_139 = arith.constant 128 : index
    %184 = vector.load %arg14[%c0_138, %c128_139] : memref<32x512xf32, #tpu.memory_space<vmem>>, vector<2x128xf32>
    tpu.vector_store %arg14[%c0_138, %c128_139], %183 {strides = array<i32>} : memref<32x512xf32, #tpu.memory_space<vmem>>, vector<2x128xf32>,
    %c2_140 = arith.constant 2 : index
    %c0_141 = arith.constant 0 : index
    %185 = tpu.strided_load %arg17[%c2_140, %c0_141] {strides = array<i32: 2, 1>} : memref<12x128xf32, #tpu.memory_space<vmem>>, vector<2x128xf32>
    %c0_142 = arith.constant 0 : index
    %c256_143 = arith.constant 256 : index
    %186 = vector.load %arg14[%c0_142, %c256_143] : memref<32x512xf32, #tpu.memory_space<vmem>>, vector<2x128xf32>
    tpu.vector_store %arg14[%c0_142, %c256_143], %185 {strides = array<i32>} : memref<32x512xf32, #tpu.memory_space<vmem>>, vector<2x128xf32>,
    %c3_144 = arith.constant 3 : index
    %c0_145 = arith.constant 0 : index
    %187 = tpu.strided_load %arg17[%c3_144, %c0_145] {strides = array<i32: 2, 1>} : memref<12x128xf32, #tpu.memory_space<vmem>>, vector<2x128xf32>
    %c0_146 = arith.constant 0 : index
    %c384_147 = arith.constant 384 : index
    %188 = vector.load %arg14[%c0_146, %c384_147] : memref<32x512xf32, #tpu.memory_space<vmem>>, vector<2x128xf32>
    tpu.vector_store %arg14[%c0_146, %c384_147], %187 {strides = array<i32>} : memref<32x512xf32, #tpu.memory_space<vmem>>, vector<2x128xf32>,
    %c6 = arith.constant 6 : index
    %c0_148 = arith.constant 0 : index
    %189 = tpu.strided_load %arg17[%c6, %c0_148] {strides = array<i32: 2, 1>} : memref<12x128xf32, #tpu.memory_space<vmem>>, vector<2x128xf32>
    %c2_149 = arith.constant 2 : index
    %c0_150 = arith.constant 0 : index
    %190 = vector.load %arg14[%c2_149, %c0_150] : memref<32x512xf32, #tpu.memory_space<vmem>>, vector<2x128xf32>
    tpu.vector_store %arg14[%c2_149, %c0_150], %189 {strides = array<i32>} : memref<32x512xf32, #tpu.memory_space<vmem>>, vector<2x128xf32>,
    %c7_151 = arith.constant 7 : index
    %c0_152 = arith.constant 0 : index
    %191 = tpu.strided_load %arg17[%c7_151, %c0_152] {strides = array<i32: 2, 1>} : memref<12x128xf32, #tpu.memory_space<vmem>>, vector<2x128xf32>
    %c2_153 = arith.constant 2 : index
    %c128_154 = arith.constant 128 : index
    %192 = vector.load %arg14[%c2_153, %c128_154] : memref<32x512xf32, #tpu.memory_space<vmem>>, vector<2x128xf32>
    tpu.vector_store %arg14[%c2_153, %c128_154], %191 {strides = array<i32>} : memref<32x512xf32, #tpu.memory_space<vmem>>, vector<2x128xf32>,
    %c8_155 = arith.constant 8 : index
    %c0_156 = arith.constant 0 : index
    %193 = tpu.strided_load %arg17[%c8_155, %c0_156] {strides = array<i32: 2, 1>} : memref<12x128xf32, #tpu.memory_space<vmem>>, vector<2x128xf32>
    %c2_157 = arith.constant 2 : index
    %c256_158 = arith.constant 256 : index
    %194 = vector.load %arg14[%c2_157, %c256_158] : memref<32x512xf32, #tpu.memory_space<vmem>>, vector<2x128xf32>
    tpu.vector_store %arg14[%c2_157, %c256_158], %193 {strides = array<i32>} : memref<32x512xf32, #tpu.memory_space<vmem>>, vector<2x128xf32>,
    %c9 = arith.constant 9 : index
    %c0_159 = arith.constant 0 : index
    %195 = tpu.strided_load %arg17[%c9, %c0_159] {strides = array<i32: 2, 1>} : memref<12x128xf32, #tpu.memory_space<vmem>>, vector<2x128xf32>
    %c2_160 = arith.constant 2 : index
    %c384_161 = arith.constant 384 : index
    %196 = vector.load %arg14[%c2_160, %c384_161] : memref<32x512xf32, #tpu.memory_space<vmem>>, vector<2x128xf32>
    tpu.vector_store %arg14[%c2_160, %c384_161], %195 {strides = array<i32>} : memref<32x512xf32, #tpu.memory_space<vmem>>, vector<2x128xf32>,
    %c0_162 = arith.constant 0 : index
    %c0_163 = arith.constant 0 : index
    %197 = vector.load %arg14[%c0_162, %c0_163] : memref<32x512xf32, #tpu.memory_space<vmem>>, vector<4x512xf32>
    %198 = arith.truncf %197 : vector<4x512xf32> to vector<4x512xbf16>
    %c0_164 = arith.constant 0 : index
    %c0_165 = arith.constant 0 : index
    %199 = vector.load %arg9[%c0_164, %c0_165] : memref<512x128xbf16, #tpu.memory_space<vmem>>, vector<512x128xbf16>
    %cst_166 = arith.constant dense<0.000000e+00> : vector<4x128xf32>
    %200 = tpu.matmul %198, %199, %cst_166 {dimension_numbers = #tpu.dot_dimension_numbers<[1], [0], [0], [1], [0, 0, 1, 1], [], []>} : vector<4x512xbf16>, vector<512x128xbf16>, vector<4x128xf32> -> vector<4x128xf32>
    %cst_167 = arith.constant dense<0.000000e+00> : vector<128xf32>
    %201 = vector.multi_reduction <add>, %200, %cst_167 [0] : vector<4x128xf32> to vector<128xf32>
    %202 = vector.shape_cast %201 : vector<128xf32> to vector<1x128xf32>
    %203 = vector.extract_strided_slice %202 {offsets = [0, 0], sizes = [1, 64], strides = [1, 1]} : vector<1x128xf32> to vector<1x64xf32>
    %204 = vector.extract_strided_slice %202 {offsets = [0, 64], sizes = [1, 64], strides = [1, 1]} : vector<1x128xf32> to vector<1x64xf32>
    %205 = arith.addf %203, %204 : vector<1x64xf32>
    %cst_168 = arith.constant 1.250000e-01 : f32
    %206 = vector.broadcast %cst_168 : f32 to vector<1x64xf32>
    %207 = arith.mulf %205, %206 : vector<1x64xf32>
    %208 = tpu.concatenate %207, %207 in 1 : vector<1x64xf32>, vector<1x64xf32> -> vector<1x128xf32>
    %209 = vector.broadcast %208 : vector<1x128xf32> to vector<4x128xf32>
    %210 = arith.subf %200, %209 : vector<4x128xf32>
    %211 = arith.mulf %210, %210 : vector<4x128xf32>
    %cst_169 = arith.constant dense<0.000000e+00> : vector<128xf32>
    %212 = vector.multi_reduction <add>, %211, %cst_169 [0] : vector<4x128xf32> to vector<128xf32>
    %213 = vector.shape_cast %212 : vector<128xf32> to vector<1x128xf32>
    %214 = vector.extract_strided_slice %213 {offsets = [0, 0], sizes = [1, 64], strides = [1, 1]} : vector<1x128xf32> to vector<1x64xf32>
    %215 = vector.extract_strided_slice %213 {offsets = [0, 64], sizes = [1, 64], strides = [1, 1]} : vector<1x128xf32> to vector<1x64xf32>
    %216 = arith.addf %214, %215 : vector<1x64xf32>
    %cst_170 = arith.constant 1.250000e-01 : f32
    %217 = vector.broadcast %cst_170 : f32 to vector<1x64xf32>
    %218 = arith.mulf %216, %217 : vector<1x64xf32>
    %c0_171 = arith.constant 0 : index
    %c0_172 = arith.constant 0 : index
    %219 = vector.load %arg10[%c0_171, %c0_172] : memref<1x64xf32, #tpu.memory_space<vmem>>, vector<1x64xf32>
    %cst_173 = arith.constant 9.99999974E-6 : f32
    %220 = vector.broadcast %cst_173 : f32 to vector<1x64xf32>
    %221 = arith.addf %218, %220 : vector<1x64xf32>
    %222 = math.rsqrt %221 : vector<1x64xf32>
    %223 = arith.mulf %219, %222 : vector<1x64xf32>
    %224 = tpu.concatenate %223, %223 in 1 : vector<1x64xf32>, vector<1x64xf32> -> vector<1x128xf32>
    %225 = vector.broadcast %224 : vector<1x128xf32> to vector<4x128xf32>
    %226 = arith.mulf %210, %225 : vector<4x128xf32>
    %c0_174 = arith.constant 0 : index
    %c0_175 = arith.constant 0 : index
    %227 = vector.load %arg11[%c0_174, %c0_175] : memref<1x64xf32, #tpu.memory_space<vmem>>, vector<1x64xf32>
    %228 = tpu.concatenate %227, %227 in 1 : vector<1x64xf32>, vector<1x64xf32> -> vector<1x128xf32>
    %229 = vector.broadcast %228 : vector<1x128xf32> to vector<4x128xf32>
    %230 = arith.addf %226, %229 : vector<4x128xf32>
    %cst_176 = arith.constant 2.000000e-01 : f32
    %231 = vector.broadcast %cst_176 : f32 to vector<4x128xf32>
    %232 = arith.mulf %231, %230 : vector<4x128xf32>
    %233 = arith.maximumf %230, %232 : vector<4x128xf32>
    %234 = vector.extract_strided_slice %233 {offsets = [0, 0], sizes = [2, 128], strides = [1, 1]} : vector<4x128xf32> to vector<2x128xf32>
    %c0_177 = arith.constant 0 : index
    %c0_178 = arith.constant 0 : index
    %235 = vector.load %arg18[%c0_177, %c0_178] : memref<4x128xf32, #tpu.memory_space<vmem>>, vector<2x128xf32>
    tpu.vector_store %arg18[%c0_177, %c0_178], %234 {strides = array<i32>} : memref<4x128xf32, #tpu.memory_space<vmem>>, vector<2x128xf32>,
    %236 = vector.extract_strided_slice %233 {offsets = [2, 0], sizes = [2, 128], strides = [1, 1]} : vector<4x128xf32> to vector<2x128xf32>
    %c2_179 = arith.constant 2 : index
    %c0_180 = arith.constant 0 : index
    %237 = vector.load %arg18[%c2_179, %c0_180] : memref<4x128xf32, #tpu.memory_space<vmem>>, vector<2x128xf32>
    tpu.vector_store %arg18[%c2_179, %c0_180], %236 {strides = array<i32>} : memref<4x128xf32, #tpu.memory_space<vmem>>, vector<2x128xf32>,
    %c0_181 = arith.constant 0 : index
    %c0_182 = arith.constant 0 : index
    %238 = vector.load %arg18[%c0_181, %c0_182] : memref<4x128xf32, #tpu.memory_space<vmem>>, vector<1x128xf32>
    %c0_183 = arith.constant 0 : index
    %c0_184 = arith.constant 0 : index
    %239 = vector.load %arg14[%c0_183, %c0_184] : memref<32x512xf32, #tpu.memory_space<vmem>>, vector<1x128xf32>
    tpu.vector_store %arg14[%c0_183, %c0_184], %238 {strides = array<i32>} : memref<32x512xf32, #tpu.memory_space<vmem>>, vector<1x128xf32>,
    %c1_185 = arith.constant 1 : index
    %c0_186 = arith.constant 0 : index
    %240 = vector.load %arg18[%c1_185, %c0_186] : memref<4x128xf32, #tpu.memory_space<vmem>>, vector<1x128xf32>
    %c0_187 = arith.constant 0 : index
    %c128_188 = arith.constant 128 : index
    %241 = vector.load %arg14[%c0_187, %c128_188] : memref<32x512xf32, #tpu.memory_space<vmem>>, vector<1x128xf32>
    tpu.vector_store %arg14[%c0_187, %c128_188], %240 {strides = array<i32>} : memref<32x512xf32, #tpu.memory_space<vmem>>, vector<1x128xf32>,
    %c2_189 = arith.constant 2 : index
    %c0_190 = arith.constant 0 : index
    %242 = vector.load %arg18[%c2_189, %c0_190] : memref<4x128xf32, #tpu.memory_space<vmem>>, vector<1x128xf32>
    %c1_191 = arith.constant 1 : index
    %c0_192 = arith.constant 0 : index
    %243 = vector.load %arg14[%c1_191, %c0_192] : memref<32x512xf32, #tpu.memory_space<vmem>>, vector<1x128xf32>
    tpu.vector_store %arg14[%c1_191, %c0_192], %242 {strides = array<i32>} : memref<32x512xf32, #tpu.memory_space<vmem>>, vector<1x128xf32>,
    %c3_193 = arith.constant 3 : index
    %c0_194 = arith.constant 0 : index
    %244 = vector.load %arg18[%c3_193, %c0_194] : memref<4x128xf32, #tpu.memory_space<vmem>>, vector<1x128xf32>
    %c1_195 = arith.constant 1 : index
    %c128_196 = arith.constant 128 : index
    %245 = vector.load %arg14[%c1_195, %c128_196] : memref<32x512xf32, #tpu.memory_space<vmem>>, vector<1x128xf32>
    tpu.vector_store %arg14[%c1_195, %c128_196], %244 {strides = array<i32>} : memref<32x512xf32, #tpu.memory_space<vmem>>, vector<1x128xf32>,
    %c0_197 = arith.constant 0 : index
    %c0_198 = arith.constant 0 : index
    %246 = vector.load %arg14[%c0_197, %c0_198] : memref<32x512xf32, #tpu.memory_space<vmem>>, vector<2x256xf32>
    %247 = arith.truncf %246 : vector<2x256xf32> to vector<2x256xbf16>
    %c0_199 = arith.constant 0 : index
    %c0_200 = arith.constant 0 : index
    %248 = vector.load %arg12[%c0_199, %c0_200] : memref<256x1xbf16, #tpu.memory_space<vmem>>, vector<256x1xbf16>
    %cst_201 = arith.constant dense<0.000000e+00> : vector<2x1xf32>
    %249 = tpu.matmul %247, %248, %cst_201 {dimension_numbers = #tpu.dot_dimension_numbers<[1], [0], [0], [1], [0, 0, 1, 1], [], []>} : vector<2x256xbf16>, vector<256x1xbf16>, vector<2x1xf32> -> vector<2x1xf32>
    %c0_202 = arith.constant 0 : index
    %c0_203 = arith.constant 0 : index
    %250 = vector.load %arg13[%c0_202, %c0_203] : memref<2x1xf32, #tpu.memory_space<vmem>>, vector<2x1xf32>
    tpu.vector_store %arg13[%c0_202, %c0_203], %249 {strides = array<i32>} : memref<2x1xf32, #tpu.memory_space<vmem>>, vector<2x1xf32>,
    return
  }
  func.func @transform_0(%arg0: i32) -> (i32, i32) {
    %c0_i32 = arith.constant 0 : i32
    %c0_i32_0 = arith.constant 0 : i32
    %c0_i32_1 = arith.constant 0 : i32
    return %c0_i32, %c0_i32_0 : i32, i32
  }
  func.func @transform_1(%arg0: i32) -> (i32, i32) {
    %c0_i32 = arith.constant 0 : i32
    %c0_i32_0 = arith.constant 0 : i32
    %c0_i32_1 = arith.constant 0 : i32
    return %c0_i32, %c0_i32_0 : i32, i32
  }
  func.func @transform_2(%arg0: i32) -> (i32, i32) {
    %c0_i32 = arith.constant 0 : i32
    %c0_i32_0 = arith.constant 0 : i32
    %c0_i32_1 = arith.constant 0 : i32
    return %c0_i32, %c0_i32_0 : i32, i32
  }
  func.func @transform_3(%arg0: i32) -> (i32, i32) {
    %c0_i32 = arith.constant 0 : i32
    %c0_i32_0 = arith.constant 0 : i32
    %c0_i32_1 = arith.constant 0 : i32
    return %c0_i32, %c0_i32_0 : i32, i32
  }
  func.func @transform_4(%arg0: i32) -> (i32, i32) {
    %c0_i32 = arith.constant 0 : i32
    %c0_i32_0 = arith.constant 0 : i32
    %c0_i32_1 = arith.constant 0 : i32
    return %c0_i32, %c0_i32_0 : i32, i32
  }
  func.func @transform_5(%arg0: i32) -> (i32, i32) {
    %c0_i32 = arith.constant 0 : i32
    %c0_i32_0 = arith.constant 0 : i32
    %c0_i32_1 = arith.constant 0 : i32
    return %c0_i32, %c0_i32_0 : i32, i32
  }
  func.func @transform_6(%arg0: i32) -> (i32, i32) {
    %c0_i32 = arith.constant 0 : i32
    %c0_i32_0 = arith.constant 0 : i32
    %c0_i32_1 = arith.constant 0 : i32
    return %c0_i32, %c0_i32_0 : i32, i32
  }
  func.func @transform_7(%arg0: i32) -> (i32, i32) {
    %c0_i32 = arith.constant 0 : i32
    %c0_i32_0 = arith.constant 0 : i32
    %c0_i32_1 = arith.constant 0 : i32
    return %c0_i32, %c0_i32_0 : i32, i32
  }
  func.func @transform_8(%arg0: i32) -> (i32, i32) {
    %c0_i32 = arith.constant 0 : i32
    %c0_i32_0 = arith.constant 0 : i32
    %c0_i32_1 = arith.constant 0 : i32
    return %c0_i32, %c0_i32_0 : i32, i32
  }
  func.func @transform_9(%arg0: i32) -> (i32, i32) {
    %c0_i32 = arith.constant 0 : i32
    %c0_i32_0 = arith.constant 0 : i32
    %c0_i32_1 = arith.constant 0 : i32
    return %c0_i32, %c0_i32_0 : i32, i32
  }
  func.func @transform_10(%arg0: i32) -> (i32, i32) {
    %c0_i32 = arith.constant 0 : i32
    %c0_i32_0 = arith.constant 0 : i32
    %c0_i32_1 = arith.constant 0 : i32
    return %c0_i32, %c0_i32_0 : i32, i32
  }
  func.func @transform_11(%arg0: i32) -> (i32, i32) {
    %c0_i32 = arith.constant 0 : i32
    %c0_i32_0 = arith.constant 0 : i32
    %c0_i32_1 = arith.constant 0 : i32
    return %c0_i32, %c0_i32_0 : i32, i32
  }
  func.func @transform_12(%arg0: i32) -> (i32, i32) {
    %c0_i32 = arith.constant 0 : i32
    %c0_i32_0 = arith.constant 0 : i32
    %c0_i32_1 = arith.constant 0 : i32
    return %c0_i32, %c0_i32_0 : i32, i32
  }
}

</mosaic_0001>

<bundles_post_ra>
// kernel: discriminator_forward.1
= control target key start
LH: loop header
LB: loop body
LE: loop exit
PB: predicated region body
PF: predicated region fallthrough
CT: control target
= control target key end

     0   :  { %v2728_v60 = vmov 0.0   ;;  %s2730_s29 = smov 112   ;;  %s2731_s30 = smov 64   ;;  %vm922_vm0 = vcmask 130048   ;;  %vm924_vm1 = vcmask 261120   ;;  %vm926_vm2 = vcmask 392192   ;;  %s3453_s1 = inlined_call_operand.vmem [shape: bf16[512,128], index: 1, kind: input, shape index: {}]   ;;  %s3454_s0 = inlined_call_operand.vmem [shape: f32[68,128], index: 0, kind: input, shape index: {}]   ;;  %s3455_s2 = inlined_call_operand.vmem [shape: bf16[512,128], index: 2, kind: input, shape index: {}]   ;;  %s3456_s4 = inlined_call_operand.vmem [shape: f32[1,16], index: 4, kind: input, shape index: {}]   ;;  %s3457_s3 = inlined_call_operand.vmem [shape: f32[1,16], index: 3, kind: input, shape index: {}]   ;;  %s3458_s5 = inlined_call_operand.vmem [shape: bf16[512,128], index: 5, kind: input, shape index: {}]   ;;  %s3459_s7 = inlined_call_operand.vmem [shape: f32[1,32], index: 7, kind: input, shape index: {}]   ;;  %s3460_s6 = inlined_call_operand.vmem [shape: f32[1,32], index: 6, kind: input, shape index: {}]   ;;  %s3461_s8 = inlined_call_operand.vmem [shape: bf16[512,128], index: 8, kind: input, shape index: {}]   ;;  %s3462_s10 = inlined_call_operand.vmem [shape: f32[1,64], index: 10, kind: input, shape index: {}]   ;;  %s3463_s11 = inlined_call_operand.vmem [shape: bf16[256,1], index: 11, kind: input, shape index: {}]   ;;  %s3464_s9 = inlined_call_operand.vmem [shape: f32[1,64], index: 9, kind: input, shape index: {}]   ;;  %s3465_s12 = inlined_call_operand.vmem [shape: f32[2,1], index: 12, kind: output, shape index: {}]  }
   0x1   :  { %v2578_v0 = vld [vmem:[%s3453_s1 + $0x40] sm:$0xff]   ;;  %v2582_v4 = vld [vmem:[%s3453_s1 + $0x48] sm:$0xff]   ;;  %v2586_v8 = vld [vmem:[%s3453_s1 + $0x50] sm:$0xff]   ;;  %42 = vst [vmem:[#allocation3] sm:$0xff] %v2728_v60  ;;  %s2733_s13 = smov 32   ;;  %s2734_s14 = smov 48  }
   0x2   :  { %v2579_v1 = vld [vmem:[%s3453_s1 + $0xc0] sm:$0xff]   ;;  %2360 = vmatprep.subr.bf16.mxu0 %v2578_v0  ;;  %v2583_v5 = vld [vmem:[%s3453_s1 + $0xc8] sm:$0xff]   ;;  %v2587_v9 = vld [vmem:[%s3453_s1 + $0xd0] sm:$0xff]   ;;  %43 = vst [vmem:[#allocation3 + $0x8] sm:$0xff] %v2728_v60  ;;  %s2735_s15 = smov 16   ;;  %vm928_vm3 = vcmask 523264  }
   0x3   :  { %v2580_v2 = vld [vmem:[%s3453_s1] sm:$0xff]   ;;  %2388 = vmatprep.subr.bf16.mxu1 %v2579_v1  ;;  %v2584_v6 = vld [vmem:[%s3453_s1 + $0x8] sm:$0xff]   ;;  %v2588_v10 = vld [vmem:[%s3453_s1 + $0x10] sm:$0xff]   ;;  %44 = vst [vmem:[#allocation3 + $0x10] sm:$0xff] %v2728_v60  ;;  %vm930_vm4 = vcmask 654336   ;;  %vm932_vm5 = vcmask 785408  }
   0x4   :  { %v2581_v3 = vld [vmem:[%s3453_s1 + $0x80] sm:$0xff]   ;;  %2361 = vmatpush3.bf16.msra.mxu0 %v2580_v2  ;;  %v2585_v7 = vld [vmem:[%s3453_s1 + $0x88] sm:$0xff]   ;;  %v2589_v11 = vld [vmem:[%s3453_s1 + $0x90] sm:$0xff]   ;;  %45 = vst [vmem:[#allocation3 + $0x18] sm:$0xff] %v2728_v60  ;;  %vm934_vm6 = vcmask 916480   ;;  %vm1940_vm7 = vcmask 1043456  }
   0x5   :  { %2389 = vmatpush3.bf16.msra.mxu1 %v2581_v3  ;;  %2362 = vmatprep.subr.bf16.mxu0 %v2582_v4  ;;  %v2590_v12 = vld [vmem:[%s3453_s1 + $0x58] sm:$0xff]   ;;  %v2594_v16 = vld [vmem:[%s3453_s1 + $0x60] sm:$0xff]   ;;  %v2598_v20 = vld [vmem:[%s3453_s1 + $0x68] sm:$0xff]   ;;  %46 = vst [vmem:[#allocation3 + $0x20] sm:$0xf] %v2728_v60  ;;  %vm2195_vm8 = vcmask 1024  }
   0x6   :  { %2390 = vmatprep.subr.bf16.mxu1 %v2583_v5  ;;  %v2591_v13 = vld [vmem:[%s3453_s1 + $0xd8] sm:$0xff]   ;;  %v2595_v17 = vld [vmem:[%s3453_s1 + $0xe0] sm:$0xff]   ;;  %v2599_v21 = vld [vmem:[%s3453_s1 + $0xe8] sm:$0xff]   ;;  %47 = vst [vmem:[#allocation4] sm:$0xff] %v2728_v60 }
   0x7   :  { %v2592_v14 = vld [vmem:[%s3453_s1 + $0x18] sm:$0xff]   ;;  %v2596_v18 = vld [vmem:[%s3453_s1 + $0x20] sm:$0xff]   ;;  %v2600_v22 = vld [vmem:[%s3453_s1 + $0x28] sm:$0xff]   ;;  %48 = vst [vmem:[#allocation4 + $0x8] sm:$0xff] %v2728_v60 }
   0x8   :  { %2363 = vmatpush3.bf16.msra.mxu0 %v2584_v6  ;;  %v2593_v15 = vld [vmem:[%s3453_s1 + $0x98] sm:$0xff]   ;;  %v2597_v19 = vld [vmem:[%s3453_s1 + $0xa0] sm:$0xff]   ;;  %v2601_v23 = vld [vmem:[%s3453_s1 + $0xa8] sm:$0xff]   ;;  %49 = vst [vmem:[#allocation4 + $0x10] sm:$0xf] %v2728_v60 }
   0x9   :  { %2391 = vmatpush3.bf16.msra.mxu1 %v2585_v7  ;;  %2364 = vmatprep.subr.bf16.mxu0 %v2586_v8  ;;  %v2602_v24 = vld [vmem:[%s3453_s1 + $0x70] sm:$0xff]   ;;  %v2606_v28 = vld [vmem:[%s3453_s1 + $0x78] sm:$0xff]   ;;  %v2202_v32 = vld [vmem:[%s3454_s0 + $0x1] ss:$2 sm:$0xff]  ;;  %50 = vst [vmem:[#allocation5] sm:$0xff] %v2728_v60 }
   0xa   :  { %2392 = vmatprep.subr.bf16.mxu1 %v2587_v9  ;;  %v2603_v25 = vld [vmem:[%s3453_s1 + $0xf0] sm:$0xff]   ;;  %v2607_v29 = vld [vmem:[%s3453_s1 + $0xf8] sm:$0xff]   ;;  %v53_v37 = vld [vmem:[%s3454_s0] ss:$2 sm:$0xff]  ;;  %51 = vst [vmem:[#allocation5 + $0x8] sm:$0xf] %v2728_v60 }
   0xb   :  { %v2604_v26 = vld [vmem:[%s3453_s1 + $0x30] sm:$0xff]   ;;  %v2608_v30 = vld [vmem:[%s3453_s1 + $0x38] sm:$0xff]   ;;  %v2610_v56 = vld [vmem:[%s3455_s2 + $0x40] sm:$0xff]   ;;  %52 = vst [vmem:[#allocation6] sm:$0xf] %v2728_v60 }
   0xc   :  { %2365 = vmatpush3.bf16.msra.mxu0 %v2588_v10  ;;  %v2605_v27 = vld [vmem:[%s3453_s1 + $0xb0] sm:$0xff]   ;;  %v2609_v31 = vld [vmem:[%s3453_s1 + $0xb8] sm:$0xff]   ;;  %v2611_v57 = vld [vmem:[%s3455_s2 + $0xc0] sm:$0xff]  }
   0xd   :  { %2393 = vmatpush3.bf16.msra.mxu1 %v2589_v11  ;;  %2366 = vmatprep.subr.bf16.mxu0 %v2590_v12  ;;  %v2203_v33 = vld [vmem:[%s3454_s0 + $0x11] ss:$2 sm:$0xff]  ;;  %v2201_v38 = vld [vmem:[%s3454_s0 + $0x10] ss:$2 sm:$0xff]  ;;  %v2612_v58 = vld [vmem:[%s3455_s2] sm:$0xff]  }
   0xe   :  { %2394 = vmatprep.subr.bf16.mxu1 %v2591_v13  ;;  %v2206_v34 = vld [vmem:[%s3454_s0 + $0x3] ss:$2 sm:$0xff]  ;;  %v117_v35 = vpack.c.bf16 %v2203_v33, %v2202_v32  ;;  %v2207_v36 = vld [vmem:[%s3454_s0 + $0x13] ss:$2 sm:$0xff]  ;;  %v116_v40 = vpack.c.bf16 %v2201_v38, %v53_v37  ;;  %v2204_v41 = vld [vmem:[%s3454_s0 + $0x2] ss:$2 sm:$0xff] }
   0xf   :  { %v119_v39 = vpack.c.bf16 %v2207_v36, %v2206_v34  ;;  %v2205_v42 = vld [vmem:[%s3454_s0 + $0x12] ss:$2 sm:$0xff]  ;;  %v2210_v43 = vld [vmem:[%s3454_s0 + $0x23] ss:$2 sm:$0xff]  ;;  %v2211_v45 = vld [vmem:[%s3454_s0 + $0x33] ss:$2 sm:$0xff] }
  0x10   :  { %2367 = vmatpush3.bf16.msra.mxu0 %v2592_v14  ;;  %412 = vmatprep.mubr.bf16.mxu0 %v117_v35  ;;  %v118_v44 = vpack.c.bf16 %v2205_v42, %v2204_v41  ;;  %v2214_v46 = vld [vmem:[%s3454_s0 + $0x25] ss:$2 sm:$0xff]  ;;  %v2215_v47 = vld [vmem:[%s3454_s0 + $0x35] ss:$2 sm:$0xff]  ;;  %v121_v48 = vpack.c.bf16 %v2211_v45, %v2210_v43  ;;  %v2208_v50 = vld [vmem:[%s3454_s0 + $0x22] ss:$2 sm:$0xff] }
  0x11   :  { %2395 = vmatpush3.bf16.msra.mxu1 %v2593_v15  ;;  %2368 = vmatprep.subr.bf16.mxu0 %v2594_v16  ;;  %v123_v49 = vpack.c.bf16 %v2215_v47, %v2214_v46  ;;  %v2209_v51 = vld [vmem:[%s3454_s0 + $0x32] ss:$2 sm:$0xff]  ;;  %v2614_v61 = vld [vmem:[%s3455_s2 + $0x48] sm:$0xff]  }
  0x12   :  { %2396 = vmatprep.subr.bf16.mxu1 %v2595_v17  ;;  %461 = vmatprep.mubr.bf16.mxu1 %v119_v39  ;;  %v2212_v52 = vld [vmem:[%s3454_s0 + $0x24] ss:$2 sm:$0xff]  ;;  %v2213_v53 = vld [vmem:[%s3454_s0 + $0x34] ss:$2 sm:$0xff]  ;;  %v120_v54 = vpack.c.bf16 %v2209_v51, %v2208_v50  ;;  %s2732_s0 = smov 96  }
  0x13   :  { %v122_v55 = vpack.c.bf16 %v2213_v53, %v2212_v52  ;;  %v2613_v59 = vld [vmem:[%s3455_s2 + $0x80] sm:$0xff]   ;;  %v2615_v62 = vld [vmem:[%s3455_s2 + $0xc8] sm:$0xff]   ;;  %v2618_v1 = vld [vmem:[%s3455_s2 + $0x50] sm:$0xff]  }
  0x14   :  { %2369 = vmatpush3.bf16.msra.mxu0 %v2596_v18  ;;  %v2616_v63 = vld [vmem:[%s3455_s2 + $0x8] sm:$0xff]   ;;  %v2619_v2 = vld [vmem:[%s3455_s2 + $0xd0] sm:$0xff]   ;;  %v2622_v5 = vld [vmem:[%s3455_s2 + $0x58] sm:$0xff]  }
  0x15   :  { %2397 = vmatpush3.bf16.msra.mxu1 %v2597_v19  ;;  %2370 = vmatprep.subr.bf16.mxu0 %v2598_v20  ;;  %v2617_v0 = vld [vmem:[%s3455_s2 + $0x88] sm:$0xff]   ;;  %v2620_v3 = vld [vmem:[%s3455_s2 + $0x10] sm:$0xff]   ;;  %v2623_v6 = vld [vmem:[%s3455_s2 + $0xd8] sm:$0xff]  }
  0x16   :  { %2398 = vmatprep.subr.bf16.mxu1 %v2599_v21  ;;  %v2621_v4 = vld [vmem:[%s3455_s2 + $0x90] sm:$0xff]   ;;  %v2624_v7 = vld [vmem:[%s3455_s2 + $0x18] sm:$0xff]   ;;  %v2626_v9 = vld [vmem:[%s3455_s2 + $0x60] sm:$0xff]  }
  0x17   :  { %v2625_v8 = vld [vmem:[%s3455_s2 + $0x98] sm:$0xff]   ;;  %v2627_v10 = vld [vmem:[%s3455_s2 + $0xe0] sm:$0xff]   ;;  %v2630_v13 = vld [vmem:[%s3455_s2 + $0x68] sm:$0xff]  }
  0x18   :  { %2371 = vmatpush3.bf16.msra.mxu0 %v2600_v22  ;;  %v2628_v11 = vld [vmem:[%s3455_s2 + $0x20] sm:$0xff]   ;;  %v2631_v14 = vld [vmem:[%s3455_s2 + $0xe8] sm:$0xff]   ;;  %v2634_v17 = vld [vmem:[%s3455_s2 + $0x70] sm:$0xff]  }
  0x19   :  { %2399 = vmatpush3.bf16.msra.mxu1 %v2601_v23  ;;  %2372 = vmatprep.subr.bf16.mxu0 %v2602_v24  ;;  %v2629_v12 = vld [vmem:[%s3455_s2 + $0xa0] sm:$0xff]   ;;  %v2632_v15 = vld [vmem:[%s3455_s2 + $0x28] sm:$0xff]   ;;  %v2635_v18 = vld [vmem:[%s3455_s2 + $0xf0] sm:$0xff]  }
  0x1a   :  { %2400 = vmatprep.subr.bf16.mxu1 %v2603_v25  ;;  %v2633_v16 = vld [vmem:[%s3455_s2 + $0xa8] sm:$0xff]   ;;  %v2636_v19 = vld [vmem:[%s3455_s2 + $0x30] sm:$0xff]   ;;  %v2638_v21 = vld [vmem:[%s3455_s2 + $0x78] sm:$0xff]  }
  0x1b   :  { %v2637_v20 = vld [vmem:[%s3455_s2 + $0xb0] sm:$0xff]   ;;  %v2639_v22 = vld [vmem:[%s3455_s2 + $0xf8] sm:$0xff]  }
  0x1c   :  { %2373 = vmatpush3.bf16.msra.mxu0 %v2604_v26  ;;  %v2640_v23 = vld [vmem:[%s3455_s2 + $0x38] sm:$0xff]  }
  0x1d   :  { %2401 = vmatpush3.bf16.msra.mxu1 %v2605_v27  ;;  %2374 = vmatprep.subr.bf16.mxu0 %v2606_v28  ;;  %v2641_v24 = vld [vmem:[%s3455_s2 + $0xb8] sm:$0xff]   ;;  %s2729_s2 = smov 80  }
  0x1e   :  { %2402 = vmatprep.subr.bf16.mxu1 %v2607_v29 }
  0x20   :  { %2375 = vmatpush3.bf16.msra.mxu0 %v2608_v30 }
  0x21   :  { %2403 = vmatpush3.bf16.msra.mxu1 %v2609_v31  ;;  %2416 = vmatprep.subr.bf16.mxu0 %v2610_v56 }
  0x22   :  { %2438 = vmatprep.subr.bf16.mxu1 %v2611_v57 }
  0x23   :  { %413 = vmatmul.mubr.bf16.vlgmr.msra.gmra.mrb[0].mxu0 %v116_v40 }
  0x24   :  { %462 = vmatmul.mubr.bf16.vlgmr.msra.gmra.mrb[0].mxu1 %v118_v44  ;;  %420 = vmatprep.mubr.bf16.mxu0 %v121_v48 }
  0x25   :  { %469 = vmatprep.mubr.bf16.mxu1 %v123_v49  ;;  %2417 = vmatpush3.bf16.msra.mxu0 %v2612_v58 }
  0x26   :  { %2439 = vmatpush3.bf16.msra.mxu1 %v2613_v59  ;;  %2418 = vmatprep.subr.bf16.mxu0 %v2614_v61 }
  0x27   :  { %2440 = vmatprep.subr.bf16.mxu1 %v2615_v62 }
  0x29   :  { %2419 = vmatpush3.bf16.msra.mxu0 %v2616_v63 }
  0x2a   :  { %2441 = vmatpush3.bf16.msra.mxu1 %v2617_v0  ;;  %2420 = vmatprep.subr.bf16.mxu0 %v2618_v1 }
  0x2b   :  { %421 = vmatmul.mubr.bf16.gmra.mrb[4].mxu0 %v120_v54  ;;  %2442 = vmatprep.subr.bf16.mxu1 %v2619_v2 }
  0x2c   :  { %470 = vmatmul.mubr.bf16.gmra.mrb[4].mxu1 %v122_v55 }
  0x2d   :  { %2421 = vmatpush3.bf16.msra.mxu0 %v2620_v3 }
  0x2e   :  { %2443 = vmatpush3.bf16.msra.mxu1 %v2621_v4  ;;  %2422 = vmatprep.subr.bf16.mxu0 %v2622_v5 }
  0x2f   :  { %2444 = vmatprep.subr.bf16.mxu1 %v2623_v6 }
  0x31   :  { %2423 = vmatpush3.bf16.msra.mxu0 %v2624_v7 }
  0x32   :  { %2445 = vmatpush3.bf16.msra.mxu1 %v2625_v8  ;;  %2424 = vmatprep.subr.bf16.mxu0 %v2626_v9 }
  0x33   :  { %2446 = vmatprep.subr.bf16.mxu1 %v2627_v10 }
  0x35   :  { %2425 = vmatpush3.bf16.msra.mxu0 %v2628_v11 }
  0x36   :  { %2447 = vmatpush3.bf16.msra.mxu1 %v2629_v12  ;;  %2426 = vmatprep.subr.bf16.mxu0 %v2630_v13 }
  0x37   :  { %2448 = vmatprep.subr.bf16.mxu1 %v2631_v14 }
  0x39   :  { %2427 = vmatpush3.bf16.msra.mxu0 %v2632_v15 }
  0x3a   :  { %2449 = vmatpush3.bf16.msra.mxu1 %v2633_v16  ;;  %2428 = vmatprep.subr.bf16.mxu0 %v2634_v17 }
  0x3b   :  { %2450 = vmatprep.subr.bf16.mxu1 %v2635_v18 }
  0x3d   :  { %2429 = vmatpush3.bf16.msra.mxu0 %v2636_v19 }
  0x3e   :  { %2451 = vmatpush3.bf16.msra.mxu1 %v2637_v20  ;;  %2430 = vmatprep.subr.bf16.mxu0 %v2638_v21 }
  0x3f   :  { %2452 = vmatprep.subr.bf16.mxu1 %v2639_v22 }
  0x41   :  { %2431 = vmatpush3.bf16.msra.mxu0 %v2640_v23 }
  0x42   :  { %2453 = vmatpush3.bf16.msra.mxu1 %v2641_v24 }
  0xf6   :  { %v2376_v25 = vpop.f32.mrb[0].mxu0 }
  0xf7   :  { %v2404_v26 = vpop.f32.mrb[0].mxu1  ;;  %v2377_v27 = vpop.f32.mrb[1].mxu0 }
  0xf8   :  { %v2378_v28 = vadd.f32 %v2377_v27, %v2376_v25  ;;  %v2405_v29 = vpop.f32.mrb[1].mxu1  ;;  %v2379_v30 = vpop.f32.mrb[2].mxu0 }
  0xf9   :  { %v2406_v31 = vadd.f32 %v2405_v29, %v2404_v26  ;;  %v2407_v32 = vpop.f32.mrb[2].mxu1  ;;  %v2380_v33 = vpop.f32.mrb[3].mxu0 }
  0xfa   :  { %v2381_v34 = vadd.f32 %v2380_v33, %v2379_v30  ;;  %v2408_v35 = vpop.f32.mrb[3].mxu1 }
  0xfb   :  { %v464_v36 = vadd.f32 %v2406_v31, %v2378_v28  ;;  %v2409_v37 = vadd.f32 %v2408_v35, %v2407_v32 }
  0xfd   :  { %v478_v38 = vmul.f32 0.2, %v464_v36  ;;  %v467_v39 = vadd.f32 %v2409_v37, %v2381_v34 }
  0xfe   :  { %v2382_v40 = vpop.f32.mrb[4].mxu0 }
  0xff   :  { %v482_v41 = vmax.f32 %v464_v36, %v478_v38  ;;  %v479_v42 = vmul.f32 0.2, %v467_v39  ;;  %v2410_v43 = vpop.f32.mrb[4].mxu1  ;;  %v2383_v44 = vpop.f32.mrb[5].mxu0 }
 0x100   :  { %v2384_v45 = vadd.f32 %v2383_v44, %v2382_v40  ;;  %v2411_v46 = vpop.f32.mrb[5].mxu1  ;;  %v2385_v47 = vpop.f32.mrb[6].mxu0 }
 0x101   :  { %486 = vst [vmem:[#allocation3 + $0x1] sm:$0xff] %v482_v41  ;;  %v483_v48 = vmax.f32 %v467_v39, %v479_v42  ;;  %v2412_v49 = vadd.f32 %v2411_v46, %v2410_v43  ;;  %v2413_v50 = vpop.f32.mrb[6].mxu1  ;;  %v2386_v51 = vpop.f32.mrb[7].mxu0 }
 0x102   :  { %v2387_v52 = vadd.f32 %v2386_v51, %v2385_v47  ;;  %v2414_v53 = vpop.f32.mrb[7].mxu1 }
 0x103   :  { %487 = vst [vmem:[#allocation3 + $0x9] sm:$0xff] %v483_v48  ;;  %v472_v54 = vadd.f32 %v2412_v49, %v2384_v45  ;;  %v2415_v55 = vadd.f32 %v2414_v53, %v2413_v50  ;;  %v936_v48 = vlaneseq }
 0x105   :  { %v480_v56 = vmul.f32 0.2, %v472_v54  ;;  %v475_v57 = vadd.f32 %v2415_v55, %v2387_v52  ;;  %v937_v53 = vshrl.u32 %v936_v48, 7  ;;  %v2658_v48 = vld [vmem:[%s3458_s5 + $0x60] sm:$0xff]  }
 0x107   :  { %v484_v58 = vmax.f32 %v472_v54, %v480_v56  ;;  %v481_v59 = vmul.f32 0.2, %v475_v57 }
 0x109   :  { %488 = vst [vmem:[#allocation3 + $0x13] sm:$0xff] %v484_v58  ;;  %v485_v60 = vmax.f32 %v475_v57, %v481_v59  ;;  %v3066_v58 = vsub.s32 0, %v937_v53  ;;  %v2663_v53 = vld [vmem:[%s3458_s5 + $0xe8] sm:$0xff]  }
 0x10a   :  { %v490_v61 = vld [vmem:[#allocation3] ss:$2 sm:$0xff]  ;;  %v493_v62 = vld [vmem:[#allocation3 + $0x1] ss:$2 sm:$0xff] }
 0x10b   :  { %v496_v63 = vld [vmem:[#allocation3 + $0x2] ss:$2 sm:$0xff]  ;;  %491 = vst [vmem:[#allocation2] sm:$0xff] %v490_v61  ;;  %494 = vst [vmem:[#allocation2 + $0x8] sm:$0xff] %v493_v62  ;;  %v499_v0 = vld [vmem:[#allocation3 + $0x3] ss:$2 sm:$0xff] }
 0x10c   :  { %497 = vst [vmem:[#allocation2 + $0x10] sm:$0xff] %v496_v63  ;;  %489 = vst [vmem:[#allocation3 + $0x1b] sm:$0xff] %v485_v60 }
 0x10d   :  { %500 = vst [vmem:[#allocation2 + $0x18] sm:$0xff] %v499_v0 }
 0x113   :  { %v502_v1 = vld [vmem:[#allocation3 + $0x12] ss:$2 sm:$0xff]  ;;  %v505_v3 = vld [vmem:[#allocation3 + $0x13] ss:$2 sm:$0xff] }
 0x114   :  { %v508_v2 = vld [vmem:[#allocation3 + $0x14] ss:$2 sm:$0xff]  ;;  %v522_v4 = vpack.c.bf16 %v505_v3, %v493_v62  ;;  %v511_v5 = vld [vmem:[#allocation3 + $0x15] ss:$2 sm:$0xff]  ;;  %v521_v6 = vpack.c.bf16 %v502_v1, %v490_v61 }
 0x115   :  { %v523_v7 = vpack.c.bf16 %v508_v2, %v496_v63  ;;  %v524_v8 = vpack.c.bf16 %v511_v5, %v499_v0 }
 0x116   :  { %813 = vmatprep.mubr.bf16.mxu0 %v522_v4 }
 0x117   :  { %854 = vmatprep.mubr.bf16.mxu1 %v524_v8  ;;  %814 = vmatmul.mubr.bf16.vlgmr.msra.gmra.mrb[8].mxu0 %v521_v6 }
 0x118   :  { %855 = vmatmul.mubr.bf16.vlgmr.msra.gmra.mrb[8].mxu1 %v523_v7 }
 0x1ea   :  { %v2432_v9 = vpop.f32.mrb[8].mxu0 }
 0x1eb   :  { %v2454_v10 = vpop.f32.mrb[8].mxu1  ;;  %v2433_v11 = vpop.f32.mrb[9].mxu0 }
 0x1ec   :  { %v2434_v12 = vadd.f32 %v2433_v11, %v2432_v9  ;;  %v2455_v13 = vpop.f32.mrb[9].mxu1  ;;  %v2435_v14 = vpop.f32.mrb[10].mxu0 }
 0x1ed   :  { %v2456_v15 = vadd.f32 %v2455_v13, %v2454_v10  ;;  %v2457_v16 = vpop.f32.mrb[10].mxu1  ;;  %v2436_v17 = vpop.f32.mrb[11].mxu0  ;;  %v3090_v10 = vld [vmem:[%s3456_s4] sm:$0x1] }
 0x1ee   :  { %v2437_v18 = vadd.f32 %v2436_v17, %v2435_v14  ;;  %v2458_v19 = vpop.f32.mrb[11].mxu1  ;;  %v1029_v11 = vrot.slane %v3090_v10, %v3066_v58 }
 0x1ef   :  { %v3041_v20 = vadd.f32 %v2456_v15, %v2434_v12  ;;  %v2459_v21 = vadd.f32 %v2458_v19, %v2457_v16 }
 0x1f1   :  { %v3043_v22 = vadd.f32 %v2459_v21, %v2437_v18 }
 0x1f3   :  { %v863_v23 = vadd.f32 %v3043_v22, %v3041_v20 }
 0x1f5   :  { %v864_v24 = vrot.slane %v863_v23, 4 }
 0x1f7   :  { %v865_v25 = vadd.f32 %v864_v24, %v863_v23 }
 0x1f9   :  { %v866_v26 = vrot.slane %v865_v25, 2 }
 0x1fb   :  { %v867_v27 = vadd.f32 %v866_v26, %v865_v25 }
 0x1fd   :  { %v868_v28 = vrot.slane %v867_v27, 1 }
 0x1ff   :  { %v869_v29 = vadd.f32 %v868_v28, %v867_v27  ;;  %v981_v28 = vld [vmem:[%s3457_s3] sm:$0x1] }
 0x201   :  { %879 = vrot.lane.b32.xlu1 %v869_v29, %s2729_s2  ;;  %871 = vrot.lane.b32.xlu0 %v869_v29, %s2730_s29 }
 0x205   :  { %883 = vrot.lane.b32.xlu1 %v869_v29, %s2731_s30  ;;  %875 = vrot.lane.b32.xlu0 %v869_v29, %s2732_s0 }
 0x209   :  { %891 = vrot.lane.b32.xlu1 %v869_v29, %s2733_s13  ;;  %887 = vrot.lane.b32.xlu0 %v869_v29, %s2734_s14 }
 0x20d   :  { %895 = vrot.lane.b32.xlu0 %v869_v29, %s2735_s15 }
 0x273   :  { %v880_v30 = vpop.permute.xlu1 %879  ;;  %v872_v31 = vpop.permute.xlu0 %871 }
 0x274   :  { %v874_v32 = vadd.f32 %v872_v31, %v869_v29 }
 0x277   :  { %v876_v33 = vpop.permute.xlu0 %875  ;;  %v884_v35 = vpop.permute.xlu1 %883 }
 0x278   :  { %v878_v34 = vadd.f32 %v876_v33, %v874_v32  ;;  %v2642_v32 = vld [vmem:[%s3458_s5 + $0x40] sm:$0xff]  }
 0x279   :  { %v2643_v33 = vld [vmem:[%s3458_s5 + $0xc0] sm:$0xff]   ;;  %2460 = vmatprep.subr.bf16.mxu0 %v2642_v32 }
 0x27a   :  { %v882_v36 = vadd.f32 %v880_v30, %v878_v34  ;;  %v2644_v34 = vld [vmem:[%s3458_s5] sm:$0xff]   ;;  %2482 = vmatprep.subr.bf16.mxu1 %v2643_v33 }
 0x27b   :  { %v888_v37 = vpop.permute.xlu0 %887  ;;  %v892_v40 = vpop.permute.xlu1 %891  ;;  %2461 = vmatpush3.bf16.msra.mxu0 %v2644_v34 }
 0x27c   :  { %v886_v38 = vadd.f32 %v884_v35, %v882_v36  ;;  %v2645_v35 = vld [vmem:[%s3458_s5 + $0x80] sm:$0xff]   ;;  %v2646_v36 = vld [vmem:[%s3458_s5 + $0x48] sm:$0xff]  }
 0x27d   :  { %2483 = vmatpush3.bf16.msra.mxu1 %v2645_v35  ;;  %2462 = vmatprep.subr.bf16.mxu0 %v2646_v36 }
 0x27e   :  { %v890_v39 = vadd.f32 %v888_v37, %v886_v38  ;;  %v2647_v37 = vld [vmem:[%s3458_s5 + $0xc8] sm:$0xff]  }
 0x27f   :  { %v896_v42 = vpop.permute.xlu0 %895  ;;  %v2648_v38 = vld [vmem:[%s3458_s5 + $0x8] sm:$0xff]   ;;  %2484 = vmatprep.subr.bf16.mxu1 %v2647_v37 }
 0x280   :  { %v894_v41 = vadd.f32 %v892_v40, %v890_v39  ;;  %v2649_v39 = vld [vmem:[%s3458_s5 + $0x88] sm:$0xff]   ;;  %2463 = vmatpush3.bf16.msra.mxu0 %v2648_v38  ;;  %v2650_v40 = vld [vmem:[%s3458_s5 + $0x50] sm:$0xff]  }
 0x281   :  { %2485 = vmatpush3.bf16.msra.mxu1 %v2649_v39  ;;  %2464 = vmatprep.subr.bf16.mxu0 %v2650_v40 }
 0x282   :  { %v898_v43 = vadd.f32 %v896_v42, %v894_v41  ;;  %v2651_v41 = vld [vmem:[%s3458_s5 + $0xd0] sm:$0xff]  }
 0x283   :  { %v2652_v42 = vld [vmem:[%s3458_s5 + $0x10] sm:$0xff]   ;;  %2486 = vmatprep.subr.bf16.mxu1 %v2651_v41 }
 0x284   :  { %v899_v44 = vmul.f32 0.0078125, %v898_v43  ;;  %v2653_v43 = vld [vmem:[%s3458_s5 + $0x90] sm:$0xff]   ;;  %2465 = vmatpush3.bf16.msra.mxu0 %v2652_v42 }
 0x285   :  { %2487 = vmatpush3.bf16.msra.mxu1 %v2653_v43 }
 0x286   :  { %904 = vrot.lane.b32.xlu0 %v899_v44, %s2733_s13  ;;  %901 = vrot.lane.b32.xlu1 %v899_v44, %s2735_s15 }
 0x28a   :  { %910 = vrot.lane.b32.xlu0 %v899_v44, %s2731_s30  ;;  %907 = vrot.lane.b32.xlu1 %v899_v44, %s2734_s14 }
 0x28e   :  { %916 = vrot.lane.b32.xlu0 %v899_v44, %s2732_s0  ;;  %913 = vrot.lane.b32.xlu1 %v899_v44, %s2729_s2 }
 0x292   :  { %919 = vrot.lane.b32.xlu1 %v899_v44, %s2730_s29 }
 0x2f8   :  { %v905_v45 = vpop.permute.xlu0 %904  ;;  %v902_v46 = vpop.permute.xlu1 %901 }
 0x2f9   :  { %v923_v47 = vsel %vm922_vm0, %v899_v44, %v902_v46  ;;  %v2654_v44 = vld [vmem:[%s3458_s5 + $0x58] sm:$0xff]  }
 0x2fa   :  { %v925_v50 = vsel %vm924_vm1, %v923_v47, %v905_v45  ;;  %v2655_v45 = vld [vmem:[%s3458_s5 + $0xd8] sm:$0xff]   ;;  %2466 = vmatprep.subr.bf16.mxu0 %v2654_v44 }
 0x2fb   :  { %v2656_v46 = vld [vmem:[%s3458_s5 + $0x18] sm:$0xff]   ;;  %2488 = vmatprep.subr.bf16.mxu1 %v2655_v45 }
 0x2fc   :  { %v911_v49 = vpop.permute.xlu0 %910  ;;  %v908_v51 = vpop.permute.xlu1 %907  ;;  %v2657_v47 = vld [vmem:[%s3458_s5 + $0x98] sm:$0xff]   ;;  %2467 = vmatpush3.bf16.msra.mxu0 %v2656_v46 }
 0x2fd   :  { %v927_v52 = vsel %vm926_vm2, %v925_v50, %v908_v51  ;;  %2489 = vmatpush3.bf16.msra.mxu1 %v2657_v47  ;;  %v2660_v50 = vld [vmem:[%s3458_s5 + $0x20] sm:$0xff]   ;;  %2468 = vmatprep.subr.bf16.mxu0 %v2658_v48 }
 0x2fe   :  { %v929_v54 = vsel %vm928_vm3, %v927_v52, %v911_v49  ;;  %v2659_v49 = vld [vmem:[%s3458_s5 + $0xe0] sm:$0xff]   ;;  %v2662_v52 = vld [vmem:[%s3458_s5 + $0x68] sm:$0xff]  }
 0x2ff   :  { %v2661_v51 = vld [vmem:[%s3458_s5 + $0xa0] sm:$0xff]   ;;  %2490 = vmatprep.subr.bf16.mxu1 %v2659_v49 }
 0x300   :  { %v914_v55 = vpop.permute.xlu1 %913  ;;  %v917_v56 = vpop.permute.xlu0 %916  ;;  %2469 = vmatpush3.bf16.msra.mxu0 %v2660_v50 }
 0x301   :  { %v931_v57 = vsel %vm930_vm4, %v929_v54, %v914_v55  ;;  %2491 = vmatpush3.bf16.msra.mxu1 %v2661_v51  ;;  %v2664_v54 = vld [vmem:[%s3458_s5 + $0x28] sm:$0xff]   ;;  %2470 = vmatprep.subr.bf16.mxu0 %v2662_v52 }
 0x302   :  { %v933_v59 = vsel %vm932_vm5, %v931_v57, %v917_v56  ;;  %v2665_v55 = vld [vmem:[%s3458_s5 + $0xa8] sm:$0xff]   ;;  %2492 = vmatprep.subr.bf16.mxu1 %v2663_v53  ;;  %v2666_v56 = vld [vmem:[%s3458_s5 + $0x70] sm:$0xff]  }
 0x303   :  { %v2667_v57 = vld [vmem:[%s3458_s5 + $0xf0] sm:$0xff]  }
 0x304   :  { %v920_v60 = vpop.permute.xlu1 %919  ;;  %2471 = vmatpush3.bf16.msra.mxu0 %v2664_v54 }
 0x305   :  { %v935_v61 = vsel %vm934_vm6, %v933_v59, %v920_v60  ;;  %2493 = vmatpush3.bf16.msra.mxu1 %v2665_v55  ;;  %v2668_v59 = vld [vmem:[%s3458_s5 + $0x30] sm:$0xff]   ;;  %2472 = vmatprep.subr.bf16.mxu0 %v2666_v56 }
 0x306   :  { %v939_v62 = vrot.slane %v935_v61, %v3066_v58  ;;  %2494 = vmatprep.subr.bf16.mxu1 %v2667_v57  ;;  %v2669_v60 = vld [vmem:[%s3458_s5 + $0xb0] sm:$0xff]   ;;  %v2670_v61 = vld [vmem:[%s3458_s5 + $0x78] sm:$0xff]  }
 0x308   :  { %v3072_v63 = vsub.f32 %v3041_v20, %v939_v62  ;;  %v3075_v0 = vsub.f32 %v3043_v22, %v939_v62  ;;  %2473 = vmatpush3.bf16.msra.mxu0 %v2668_v59  ;;  %v2671_v62 = vld [vmem:[%s3458_s5 + $0xf8] sm:$0xff]  }
 0x309   :  { %2495 = vmatpush3.bf16.msra.mxu1 %v2669_v60  ;;  %2474 = vmatprep.subr.bf16.mxu0 %v2670_v61 }
 0x30a   :  { %v942_v1 = vmul.f32 %v3072_v63, %v3072_v63  ;;  %v943_v2 = vmul.f32 %v3075_v0, %v3075_v0  ;;  %2496 = vmatprep.subr.bf16.mxu1 %v2671_v62 }
 0x30c   :  { %v944_v3 = vadd.f32 %v943_v2, %v942_v1  ;;  %v2672_v1 = vld [vmem:[%s3458_s5 + $0x38] sm:$0xff]  }
 0x30d   :  { %v2673_v2 = vld [vmem:[%s3458_s5 + $0xb8] sm:$0xff]   ;;  %2475 = vmatpush3.bf16.msra.mxu0 %v2672_v1 }
 0x30e   :  { %v945_v4 = vrot.slane %v944_v3, 4  ;;  %2497 = vmatpush3.bf16.msra.mxu1 %v2673_v2 }
 0x310   :  { %v946_v5 = vadd.f32 %v945_v4, %v944_v3 }
 0x312   :  { %v947_v6 = vrot.slane %v946_v5, 2 }
 0x314   :  { %v948_v7 = vadd.f32 %v947_v6, %v946_v5 }
 0x316   :  { %v949_v8 = vrot.slane %v948_v7, 1 }
 0x318   :  { %v950_v9 = vadd.f32 %v949_v8, %v948_v7 }
 0x31a   :  { %956 = vrot.lane.b32.xlu1 %v950_v9, %s2732_s0  ;;  %952 = vrot.lane.b32.xlu0 %v950_v9, %s2730_s29 }
 0x31e   :  { %964 = vrot.lane.b32.xlu1 %v950_v9, %s2731_s30  ;;  %960 = vrot.lane.b32.xlu0 %v950_v9, %s2729_s2 }
 0x322   :  { %972 = vrot.lane.b32.xlu1 %v950_v9, %s2733_s13  ;;  %968 = vrot.lane.b32.xlu0 %v950_v9, %s2734_s14 }
 0x326   :  { %976 = vrot.lane.b32.xlu0 %v950_v9, %s2735_s15 }
 0x32a   :  { %1030 = vrot.lane.b32.xlu0 %v1029_v11, %s2735_s15 }
 0x32e   :  { %1033 = vrot.lane.b32.xlu0 %v1029_v11, %s2733_s13 }
 0x332   :  { %1036 = vrot.lane.b32.xlu0 %v1029_v11, %s2734_s14 }
 0x336   :  { %1039 = vrot.lane.b32.xlu0 %v1029_v11, %s2731_s30 }
 0x38c   :  { %v957_v12 = vpop.permute.xlu1 %956  ;;  %v953_v13 = vpop.permute.xlu0 %952 }
 0x38d   :  { %v955_v14 = vadd.f32 %v953_v13, %v950_v9 }
 0x38f   :  { %v959_v15 = vadd.f32 %v957_v12, %v955_v14 }
 0x390   :  { %v965_v16 = vpop.permute.xlu1 %964  ;;  %v961_v17 = vpop.permute.xlu0 %960 }
 0x391   :  { %v963_v18 = vadd.f32 %v961_v17, %v959_v15 }
 0x393   :  { %v967_v19 = vadd.f32 %v965_v16, %v963_v18 }
 0x394   :  { %v969_v20 = vpop.permute.xlu0 %968  ;;  %v973_v22 = vpop.permute.xlu1 %972 }
 0x395   :  { %v971_v21 = vadd.f32 %v969_v20, %v967_v19 }
 0x397   :  { %v975_v23 = vadd.f32 %v973_v22, %v971_v21 }
 0x398   :  { %v977_v24 = vpop.permute.xlu0 %976 }
 0x399   :  { %v979_v25 = vadd.f32 %v977_v24, %v975_v23 }
 0x39b   :  { %v980_v26 = vmul.f32 0.0078125, %v979_v25 }
 0x39c   :  { %v1031_v3 = vpop.permute.xlu0 %1030 }
 0x39d   :  { %v982_v27 = vadd.f32 1e-05, %v980_v26 }
 0x39f   :  { %2722 = vrsqrt.f32 %v982_v27 }
 0x3a0   :  { %v1034_v4 = vpop.permute.xlu0 %1033 }
 0x3a4   :  { %v1037_v6 = vpop.permute.xlu0 %1036 }
 0x3a8   :  { %v1040_v8 = vpop.permute.xlu0 %1039 }
 0x3a9   :  { %v2723_v29 = vpop.eup %2722 }
 0x3aa   :  { %v3102_v30 = vmul.f32 %v2723_v29, %v981_v28 }
 0x3ac   :  { %v989_v31 = vrot.slane %v3102_v30, %v3066_v58 }
 0x3ae   :  { %993 = vrot.lane.b32.xlu0 %v989_v31, %s2733_s13  ;;  %990 = vrot.lane.b32.xlu1 %v989_v31, %s2735_s15 }
 0x3b2   :  { %996 = vrot.lane.b32.xlu1 %v989_v31, %s2734_s14  ;;  %1042 = vrot.lane.b32.xlu0 %v1029_v11, %s2729_s2 }
 0x3b6   :  { %999 = vrot.lane.b32.xlu1 %v989_v31, %s2731_s30  ;;  %1048 = vrot.lane.b32.xlu0 %v1029_v11, %s2730_s29 }
 0x3ba   :  { %1002 = vrot.lane.b32.xlu1 %v989_v31, %s2729_s2 }
 0x3be   :  { %1005 = vrot.lane.b32.xlu1 %v989_v31, %s2732_s0 }
 0x3c2   :  { %1008 = vrot.lane.b32.xlu1 %v989_v31, %s2730_s29 }
 0x3c6   :  { %1045 = vrot.lane.b32.xlu1 %v1029_v11, %s2732_s0  ;;  %v1051_v11 = vsel %vm922_vm0, %v3090_v10, %v1031_v3 }
 0x3c7   :  { %v1052_v15 = vsel %vm924_vm1, %v1051_v11, %v1034_v4 }
 0x3c8   :  { %v1053_v19 = vsel %vm926_vm2, %v1052_v15, %v1037_v6 }
 0x3c9   :  { %v1054_v24 = vsel %vm928_vm3, %v1053_v19, %v1040_v8 }
 0x420   :  { %v991_v5 = vpop.permute.xlu1 %990  ;;  %v994_v14 = vpop.permute.xlu0 %993 }
 0x421   :  { %v1011_v13 = vsel %vm922_vm0, %v3102_v30, %v991_v5 }
 0x422   :  { %v1012_v16 = vsel %vm924_vm1, %v1011_v13, %v994_v14 }
 0x424   :  { %v997_v7 = vpop.permute.xlu1 %996  ;;  %v1043_v21 = vpop.permute.xlu0 %1042 }
 0x425   :  { %v1013_v18 = vsel %vm926_vm2, %v1012_v16, %v997_v7  ;;  %v1055_v28 = vsel %vm930_vm4, %v1054_v24, %v1043_v21 }
 0x428   :  { %v1000_v9 = vpop.permute.xlu1 %999  ;;  %v1049_v27 = vpop.permute.xlu0 %1048 }
 0x429   :  { %v1014_v20 = vsel %vm928_vm3, %v1013_v18, %v1000_v9 }
 0x42c   :  { %v1003_v12 = vpop.permute.xlu1 %1002 }
 0x42d   :  { %v1015_v22 = vsel %vm930_vm4, %v1014_v20, %v1003_v12 }
 0x430   :  { %v1006_v17 = vpop.permute.xlu1 %1005 }
 0x431   :  { %v1016_v10 = vsel %vm932_vm5, %v1015_v22, %v1006_v17 }
 0x434   :  { %v1009_v23 = vpop.permute.xlu1 %1008 }
 0x435   :  { %v1017_v25 = vsel %vm934_vm6, %v1016_v10, %v1009_v23 }
 0x436   :  { %v1021_v26 = vrot.slane %v1017_v25, %v3066_v58 }
 0x438   :  { %v1046_v29 = vpop.permute.xlu1 %1045  ;;  %v1022_v32 = vmul.f32 %v1021_v26, %v3072_v63  ;;  %v1023_v33 = vmul.f32 %v1021_v26, %v3075_v0 }
 0x439   :  { %v1056_v30 = vsel %vm932_vm5, %v1055_v28, %v1046_v29 }
 0x43a   :  { %v1057_v31 = vsel %vm934_vm6, %v1056_v30, %v1049_v27 }
 0x43b   :  { %v1061_v34 = vrot.slane %v1057_v31, %v3066_v58 }
 0x43d   :  { %v1062_v35 = vadd.f32 %v1061_v34, %v1022_v32  ;;  %v1063_v36 = vadd.f32 %v1061_v34, %v1023_v33 }
 0x43f   :  { %v1064_v37 = vmul.f32 0.2, %v1062_v35  ;;  %v1065_v38 = vmul.f32 0.2, %v1063_v36 }
 0x441   :  { %v1066_v39 = vmax.f32 %v1062_v35, %v1064_v37  ;;  %v1067_v40 = vmax.f32 %v1063_v36, %v1065_v38  ;;  %v3251_v37 = vld [vmem:[%s3459_s7] sm:$0x1] }
 0x442   :  { %v1539_v38 = vrot.slane %v3251_v37, %v3066_v58 }
 0x443   :  { %1068 = vst [vmem:[#allocation4 + $0x1] sm:$0xff] %v1066_v39  ;;  %1069 = vst [vmem:[#allocation4 + $0xb] sm:$0xff] %v1067_v40 }
 0x44a   :  { %v1070_v41 = vld [vmem:[#allocation4] ss:$2 sm:$0xf]  ;;  %v1073_v42 = vld [vmem:[#allocation4 + $0x1] ss:$2 sm:$0xf] }
 0x44b   :  { %1071 = vst [vmem:[#allocation2] sm:$0xf] %v1070_v41  ;;  %v1076_v43 = vld [vmem:[#allocation4 + $0x2] ss:$2 sm:$0xf] }
 0x44c   :  { %v1082_v44 = vld [vmem:[#allocation4 + $0xa] ss:$2 sm:$0xf]  ;;  %1074 = vst [vmem:[#allocation2 + $0x8] sm:$0xf] %v1073_v42 }
 0x44d   :  { %v1084_v45 = vrot.slane %v1082_v44, 4  ;;  %v1088_v63 = vld [vmem:[#allocation4 + $0xb] ss:$2 sm:$0xf]  ;;  %1077 = vst [vmem:[#allocation2 + $0x10] sm:$0xf] %v1076_v43 }
 0x44e   :  { %v1090_v0 = vrot.slane %v1088_v63, 4  ;;  %v1094_v46 = vld [vmem:[#allocation4 + $0xc] ss:$2 sm:$0xf] }
 0x44f   :  { %v1096_v47 = vrot.slane %v1094_v46, 4  ;;  %1086 = vst [vmem:[#allocation2] sm:$0xf0] %v1084_v45  ;;  %v1079_v48 = vld [vmem:[#allocation4 + $0x3] ss:$2 sm:$0xf] }
 0x450   :  { %1092 = vst [vmem:[#allocation2 + $0x8] sm:$0xf0] %v1090_v0  ;;  %1080 = vst [vmem:[#allocation2 + $0x18] sm:$0xf] %v1079_v48  ;;  %v1508_v0 = vld [vmem:[%s3460_s6] sm:$0x1] }
 0x451   :  { %v1100_v49 = vld [vmem:[#allocation4 + $0xd] ss:$2 sm:$0xf]  ;;  %1098 = vst [vmem:[#allocation2 + $0x10] sm:$0xf0] %v1096_v47  ;;  %v2674_v46 = vld [vmem:[%s3461_s8 + $0x40] sm:$0xff]  }
 0x452   :  { %v1102_v50 = vrot.slane %v1100_v49, 4  ;;  %v2675_v47 = vld [vmem:[%s3461_s8 + $0xc0] sm:$0xff]   ;;  %2504 = vmatprep.subr.bf16.mxu0 %v2674_v46 }
 0x453   :  { %v2676_v48 = vld [vmem:[%s3461_s8] sm:$0xff]   ;;  %2526 = vmatprep.subr.bf16.mxu1 %v2675_v47 }
 0x454   :  { %1104 = vst [vmem:[#allocation2 + $0x18] sm:$0xf0] %v1102_v50  ;;  %v2677_v50 = vld [vmem:[%s3461_s8 + $0x80] sm:$0xff]  }
 0x456   :  { %v1105_v51 = vld [vmem:[#allocation2] sm:$0xff] }
 0x457   :  { %v1106_v52 = vld [vmem:[#allocation2 + $0x8] sm:$0xff]  ;;  %v1109_v53 = vpack.c.bf16 %v1105_v51, %v1105_v51 }
 0x458   :  { %v1110_v54 = vpack.c.bf16 %v1106_v52, %v1106_v52  ;;  %v1107_v55 = vld [vmem:[#allocation2 + $0x10] sm:$0xff] }
 0x459   :  { %v1111_v57 = vpack.c.bf16 %v1107_v55, %v1107_v55  ;;  %v2680_v55 = vld [vmem:[%s3461_s8 + $0x8] sm:$0xff]  }
 0x45a   :  { %1401 = vmatprep.mubr.bf16.mxu0 %v1110_v54  ;;  %v2679_v54 = vld [vmem:[%s3461_s8 + $0xc8] sm:$0xff]  }
 0x45b   :  { %v1108_v56 = vld [vmem:[#allocation2 + $0x18] sm:$0xff]  ;;  %1402 = vmatmul.mubr.bf16.vlgmr.msra.gmra.mrb[12].mxu0 %v1109_v53  ;;  %v2678_v53 = vld [vmem:[%s3461_s8 + $0x48] sm:$0xff]  }
 0x45c   :  { %v1112_v59 = vpack.c.bf16 %v1108_v56, %v1108_v56  ;;  %2505 = vmatpush3.bf16.msra.mxu0 %v2676_v48  ;;  %v2681_v56 = vld [vmem:[%s3461_s8 + $0x88] sm:$0xff]  }
 0x45d   :  { %2506 = vmatprep.subr.bf16.mxu0 %v2678_v53 }
 0x45e   :  { %1441 = vmatprep.mubr.bf16.mxu1 %v1112_v59  ;;  %v2683_v59 = vld [vmem:[%s3461_s8 + $0xd0] sm:$0xff]  }
 0x45f   :  { %1442 = vmatmul.mubr.bf16.vlgmr.msra.gmra.mrb[12].mxu1 %v1111_v57  ;;  %v2682_v57 = vld [vmem:[%s3461_s8 + $0x50] sm:$0xff]  }
 0x460   :  { %2527 = vmatpush3.bf16.msra.mxu1 %v2677_v50  ;;  %2507 = vmatpush3.bf16.msra.mxu0 %v2680_v55 }
 0x461   :  { %2528 = vmatprep.subr.bf16.mxu1 %v2679_v54  ;;  %2508 = vmatprep.subr.bf16.mxu0 %v2682_v57 }
 0x464   :  { %2529 = vmatpush3.bf16.msra.mxu1 %v2681_v56 }
 0x465   :  { %2530 = vmatprep.subr.bf16.mxu1 %v2683_v59 }
 0x52e   :  { %v2476_v60 = vpop.f32.mrb[12].mxu0 }
 0x52f   :  { %v2477_v61 = vpop.f32.mrb[13].mxu0 }
 0x530   :  { %v2478_v62 = vadd.f32 %v2477_v61, %v2476_v60  ;;  %v2479_v1 = vpop.f32.mrb[14].mxu0  ;;  %v2684_v60 = vld [vmem:[%s3461_s8 + $0x10] sm:$0xff]  }
 0x531   :  { %v2480_v3 = vpop.f32.mrb[15].mxu0  ;;  %v2685_v61 = vld [vmem:[%s3461_s8 + $0x90] sm:$0xff]   ;;  %2509 = vmatpush3.bf16.msra.mxu0 %v2684_v60  ;;  %v2687_v1 = vld [vmem:[%s3461_s8 + $0xd8] sm:$0xff]  }
 0x532   :  { %v2498_v2 = vpop.f32.mrb[12].mxu1  ;;  %2531 = vmatpush3.bf16.msra.mxu1 %v2685_v61  ;;  %v2689_v3 = vld [vmem:[%s3461_s8 + $0x98] sm:$0xff]  }
 0x533   :  { %v2499_v4 = vpop.f32.mrb[13].mxu1  ;;  %2532 = vmatprep.subr.bf16.mxu1 %v2687_v1 }
 0x534   :  { %v2500_v5 = vadd.f32 %v2499_v4, %v2498_v2  ;;  %v2501_v6 = vpop.f32.mrb[14].mxu1  ;;  %v2688_v2 = vld [vmem:[%s3461_s8 + $0x18] sm:$0xff]   ;;  %v2690_v4 = vld [vmem:[%s3461_s8 + $0x60] sm:$0xff]  }
 0x535   :  { %v2502_v7 = vpop.f32.mrb[15].mxu1  ;;  %v2692_v6 = vld [vmem:[%s3461_s8 + $0x20] sm:$0xff]  }
 0x536   :  { %v1444_v8 = vadd.f32 %v2500_v5, %v2478_v62  ;;  %v2686_v62 = vld [vmem:[%s3461_s8 + $0x58] sm:$0xff]   ;;  %2533 = vmatpush3.bf16.msra.mxu1 %v2689_v3  ;;  %v2691_v5 = vld [vmem:[%s3461_s8 + $0xe0] sm:$0xff]  }
 0x537   :  { %2510 = vmatprep.subr.bf16.mxu0 %v2686_v62  ;;  %v2693_v7 = vld [vmem:[%s3461_s8 + $0xa0] sm:$0xff]   ;;  %2534 = vmatprep.subr.bf16.mxu1 %v2691_v5 }
 0x538   :  { %v1449_v9 = vrot.slane %v1444_v8, 4  ;;  %2511 = vmatpush3.bf16.msra.mxu0 %v2688_v2 }
 0x539   :  { %2512 = vmatprep.subr.bf16.mxu0 %v2690_v4 }
 0x53a   :  { %v1450_v11 = vadd.f32 %v1449_v9, %v1444_v8  ;;  %2535 = vmatpush3.bf16.msra.mxu1 %v2693_v7  ;;  %v2695_v9 = vld [vmem:[%s3461_s8 + $0xe8] sm:$0xff]  }
 0x53b   :  { %2536 = vmatprep.subr.bf16.mxu1 %v2695_v9 }
 0x53c   :  { %v1451_v12 = vrot.slane %v1450_v11, 2  ;;  %2513 = vmatpush3.bf16.msra.mxu0 %v2692_v6 }
 0x53e   :  { %v1452_v13 = vadd.f32 %v1451_v12, %v1450_v11  ;;  %v2696_v11 = vld [vmem:[%s3461_s8 + $0x28] sm:$0xff]  }
 0x53f   :  { %v2697_v12 = vld [vmem:[%s3461_s8 + $0xa8] sm:$0xff]  }
 0x540   :  { %v1453_v14 = vrot.slane %v1452_v13, 1  ;;  %2537 = vmatpush3.bf16.msra.mxu1 %v2697_v12 }
 0x542   :  { %v1454_v15 = vadd.f32 %v1453_v14, %v1452_v13  ;;  %v2698_v13 = vld [vmem:[%s3461_s8 + $0x70] sm:$0xff]  }
 0x543   :  { %v2699_v14 = vld [vmem:[%s3461_s8 + $0xf0] sm:$0xff]  }
 0x544   :  { %1460 = vrot.lane.b32.xlu0 %v1454_v15, %s2731_s30  ;;  %1456 = vrot.lane.b32.xlu1 %v1454_v15, %s2732_s0 }
 0x545   :  { %2538 = vmatprep.subr.bf16.mxu1 %v2699_v14 }
 0x548   :  { %1464 = vrot.lane.b32.xlu1 %v1454_v15, %s2733_s13 }
 0x5b6   :  { %v1457_v16 = vpop.permute.xlu1 %1456  ;;  %v1461_v18 = vpop.permute.xlu0 %1460 }
 0x5b7   :  { %v1459_v17 = vadd.f32 %v1457_v16, %v1454_v15  ;;  %v2700_v15 = vld [vmem:[%s3461_s8 + $0x30] sm:$0xff]  }
 0x5b8   :  { %v2701_v16 = vld [vmem:[%s3461_s8 + $0xb0] sm:$0xff]  }
 0x5b9   :  { %v1463_v19 = vadd.f32 %v1461_v18, %v1459_v17  ;;  %v2702_v17 = vld [vmem:[%s3461_s8 + $0x78] sm:$0xff]   ;;  %2539 = vmatpush3.bf16.msra.mxu1 %v2701_v16 }
 0x5ba   :  { %v1465_v20 = vpop.permute.xlu1 %1464  ;;  %v2703_v18 = vld [vmem:[%s3461_s8 + $0xf8] sm:$0xff]  }
 0x5bb   :  { %v1467_v21 = vadd.f32 %v1465_v20, %v1463_v19  ;;  %v2704_v19 = vld [vmem:[%s3461_s8 + $0x38] sm:$0xff]   ;;  %2540 = vmatprep.subr.bf16.mxu1 %v2703_v18 }
 0x5bc   :  { %v2705_v20 = vld [vmem:[%s3461_s8 + $0xb8] sm:$0xff]  }
 0x5bd   :  { %v1468_v22 = vmul.f32 0.03125, %v1467_v21  ;;  %2541 = vmatpush3.bf16.msra.mxu1 %v2705_v20 }
 0x5bf   :  { %1473 = vrot.lane.b32.xlu1 %v1468_v22, %s2731_s30  ;;  %1470 = vrot.lane.b32.xlu0 %v1468_v22, %s2733_s13 }
 0x5c3   :  { %1476 = vrot.lane.b32.xlu0 %v1468_v22, %s2732_s0 }
 0x631   :  { %v1471_v10 = vpop.permute.xlu0 %1470  ;;  %v1474_v23 = vpop.permute.xlu1 %1473 }
 0x632   :  { %v1479_v24 = vsel %vm924_vm1, %v1468_v22, %v1471_v10 }
 0x633   :  { %v1480_v25 = vsel %vm928_vm3, %v1479_v24, %v1474_v23 }
 0x635   :  { %v1477_v26 = vpop.permute.xlu0 %1476 }
 0x636   :  { %v1481_v27 = vsel %vm932_vm5, %v1480_v25, %v1477_v26 }
 0x637   :  { %v1485_v28 = vrot.slane %v1481_v27, %v3066_v58 }
 0x639   :  { %v3242_v29 = vsub.f32 %v1444_v8, %v1485_v28  ;;  %v2694_v8 = vld [vmem:[%s3461_s8 + $0x68] sm:$0xff]  }
 0x63a   :  { %2514 = vmatprep.subr.bf16.mxu0 %v2694_v8 }
 0x63b   :  { %v1487_v30 = vmul.f32 %v3242_v29, %v3242_v29  ;;  %2515 = vmatpush3.bf16.msra.mxu0 %v2696_v11 }
 0x63c   :  { %2516 = vmatprep.subr.bf16.mxu0 %v2698_v13 }
 0x63d   :  { %v1488_v31 = vrot.slane %v1487_v30, 4 }
 0x63f   :  { %v1489_v32 = vadd.f32 %v1488_v31, %v1487_v30  ;;  %2517 = vmatpush3.bf16.msra.mxu0 %v2700_v15 }
 0x640   :  { %2518 = vmatprep.subr.bf16.mxu0 %v2702_v17 }
 0x641   :  { %v1490_v33 = vrot.slane %v1489_v32, 2 }
 0x643   :  { %v1491_v34 = vadd.f32 %v1490_v33, %v1489_v32  ;;  %2519 = vmatpush3.bf16.msra.mxu0 %v2704_v19 }
 0x645   :  { %v1492_v35 = vrot.slane %v1491_v34, 1 }
 0x647   :  { %v1493_v36 = vadd.f32 %v1492_v35, %v1491_v34 }
 0x649   :  { %1499 = vrot.lane.b32.xlu0 %v1493_v36, %s2731_s30  ;;  %1495 = vrot.lane.b32.xlu1 %v1493_v36, %s2732_s0 }
 0x64d   :  { %1503 = vrot.lane.b32.xlu1 %v1493_v36, %s2733_s13 }
 0x651   :  { %1540 = vrot.lane.b32.xlu1 %v1539_v38, %s2733_s13 }
 0x6bb   :  { %v1496_v39 = vpop.permute.xlu1 %1495  ;;  %v1500_v41 = vpop.permute.xlu0 %1499 }
 0x6bc   :  { %v1498_v40 = vadd.f32 %v1496_v39, %v1493_v36 }
 0x6be   :  { %v1502_v42 = vadd.f32 %v1500_v41, %v1498_v40 }
 0x6bf   :  { %v1504_v43 = vpop.permute.xlu1 %1503 }
 0x6c0   :  { %v1506_v44 = vadd.f32 %v1504_v43, %v1502_v42 }
 0x6c2   :  { %v1507_v45 = vmul.f32 0.03125, %v1506_v44 }
 0x6c3   :  { %v1541_v21 = vpop.permute.xlu1 %1540 }
 0x6c4   :  { %v1509_v63 = vadd.f32 1e-05, %v1507_v45  ;;  %v1549_v30 = vsel %vm924_vm1, %v3251_v37, %v1541_v21 }
 0x6c6   :  { %2724 = vrsqrt.f32 %v1509_v63 }
 0x6d0   :  { %v2725_v49 = vpop.eup %2724 }
 0x6d1   :  { %v3272_v51 = vmul.f32 %v2725_v49, %v1508_v0 }
 0x6d3   :  { %v1516_v52 = vrot.slane %v3272_v51, %v3066_v58 }
 0x6d5   :  { %1520 = vrot.lane.b32.xlu1 %v1516_v52, %s2731_s30  ;;  %1517 = vrot.lane.b32.xlu0 %v1516_v52, %s2733_s13 }
 0x6d9   :  { %1523 = vrot.lane.b32.xlu0 %v1516_v52, %s2732_s0  ;;  %1546 = vrot.lane.b32.xlu1 %v1539_v38, %s2732_s0 }
 0x6dd   :  { %1543 = vrot.lane.b32.xlu0 %v1539_v38, %s2731_s30 }
 0x747   :  { %v1518_v22 = vpop.permute.xlu0 %1517  ;;  %v1521_v23 = vpop.permute.xlu1 %1520 }
 0x748   :  { %v1526_v10 = vsel %vm924_vm1, %v3272_v51, %v1518_v22 }
 0x749   :  { %v1527_v24 = vsel %vm928_vm3, %v1526_v10, %v1521_v23 }
 0x74b   :  { %v1524_v25 = vpop.permute.xlu0 %1523  ;;  %v1547_v28 = vpop.permute.xlu1 %1546 }
 0x74c   :  { %v1528_v26 = vsel %vm932_vm5, %v1527_v24, %v1524_v25 }
 0x74d   :  { %v1532_v27 = vrot.slane %v1528_v26, %v3066_v58 }
 0x74f   :  { %v1544_v31 = vpop.permute.xlu0 %1543  ;;  %v1533_v34 = vmul.f32 %v1532_v27, %v3242_v29 }
 0x750   :  { %v1550_v32 = vsel %vm928_vm3, %v1549_v30, %v1544_v31  ;;  %v2706_v31 = vld [vmem:[%s3463_s11 + $0x40] sm:$0xff]  }
 0x751   :  { %v1551_v33 = vsel %vm932_vm5, %v1550_v32, %v1547_v28  ;;  %v1996_v28 = vld [vmem:[%s3462_s10] sm:$0x1]  ;;  %2548 = vmatprep.subr.bf16.mxu0 %v2706_v31 }
 0x752   :  { %v1555_v35 = vrot.slane %v1551_v33, %v3066_v58  ;;  %v2001_v30 = vrot.slane %v1996_v28, %v3066_v58  ;;  %v2707_v32 = vld [vmem:[%s3463_s11] sm:$0xff]  }
 0x754   :  { %v1556_v36 = vadd.f32 %v1555_v35, %v1533_v34 }
 0x756   :  { %v1557_v38 = vmul.f32 0.2, %v1556_v36 }
 0x758   :  { %v1558_v39 = vmax.f32 %v1556_v36, %v1557_v38  ;;  %v2708_v38 = vld [vmem:[%s3463_s11 + $0x48] sm:$0xff]  }
 0x75a   :  { %1559 = vst [vmem:[#allocation5 + $0x1] ss:$6 sps:$4 sm:$0xff] %v1558_v39   ;;  %v2709_v39 = vld [vmem:[%s3463_s11 + $0x8] sm:$0xff]  }
 0x761   :  { %v1561_v40 = vld [vmem:[#allocation5] ss:$2 sm:$0x3]  ;;  %v1564_v41 = vld [vmem:[#allocation5 + $0x1] ss:$2 sm:$0x3] }
 0x762   :  { %v1567_v42 = vld [vmem:[#allocation5 + $0x2] ss:$2 sm:$0x3]  ;;  %v1573_v43 = vld [vmem:[#allocation5 + $0x6] ss:$2 sm:$0x3] }
 0x763   :  { %1562 = vst [vmem:[#allocation2] sm:$0x3] %v1561_v40  ;;  %1565 = vst [vmem:[#allocation2 + $0x8] sm:$0x3] %v1564_v41  ;;  %v1575_v37 = vrot.slane %v1573_v43, 6  ;;  %v2710_v40 = vld [vmem:[%s3463_s11 + $0x50] sm:$0xff]  }
 0x764   :  { %v1579_v44 = vld [vmem:[#allocation5 + $0x7] ss:$2 sm:$0x3]  ;;  %1568 = vst [vmem:[#allocation2 + $0x10] sm:$0x3] %v1567_v42  ;;  %v2711_v42 = vld [vmem:[%s3463_s11 + $0x10] sm:$0xff]  }
 0x765   :  { %v1581_v45 = vrot.slane %v1579_v44, 6  ;;  %v1585_v63 = vld [vmem:[#allocation5 + $0x8] ss:$2 sm:$0x3]  ;;  %1577 = vst [vmem:[#allocation2] sm:$0xc] %v1575_v37 }
 0x766   :  { %v1587_v0 = vrot.slane %v1585_v63, 6  ;;  %v1591_v46 = vld [vmem:[#allocation5 + $0x9] ss:$2 sm:$0x3]  ;;  %v1978_v41 = vld [vmem:[%s3464_s9] sm:$0x1] }
 0x767   :  { %v1593_v29 = vrot.slane %v1591_v46, 6  ;;  %1583 = vst [vmem:[#allocation2 + $0x8] sm:$0xc] %v1581_v45  ;;  %v1570_v47 = vld [vmem:[#allocation5 + $0x3] ss:$2 sm:$0x3] }
 0x768   :  { %1589 = vst [vmem:[#allocation2 + $0x10] sm:$0xc] %v1587_v0  ;;  %1571 = vst [vmem:[#allocation2 + $0x18] sm:$0x3] %v1570_v47  ;;  %v2712_v44 = vld [vmem:[%s3463_s11 + $0x58] sm:$0xff]   ;;  %v2714_v0 = vld [vmem:[%s3463_s11 + $0x60] sm:$0xff]  }
 0x769   :  { %1595 = vst [vmem:[#allocation2 + $0x18] sm:$0xc] %v1593_v29  ;;  %v2713_v45 = vld [vmem:[%s3463_s11 + $0x18] sm:$0xff]   ;;  %v2715_v46 = vld [vmem:[%s3463_s11 + $0x20] sm:$0xff]   ;;  %v2716_v29 = vld [vmem:[%s3463_s11 + $0x68] sm:$0xff]  }
 0x76a   :  { %v2717_v47 = vld [vmem:[%s3463_s11 + $0x28] sm:$0xff]  }
 0x76c   :  { %v1596_v48 = vld [vmem:[#allocation2] sm:$0xf] }
 0x76d   :  { %v1600_v50 = vpack.c.bf16 %v1596_v48, %v1596_v48  ;;  %v2718_v48 = vld [vmem:[%s3463_s11 + $0x70] sm:$0xff]  }
 0x76e   :  { %v1597_v49 = vld [vmem:[#allocation2 + $0x8] sm:$0xf] }
 0x76f   :  { %v1601_v51 = vpack.c.bf16 %v1597_v49, %v1597_v49  ;;  %v1598_v52 = vld [vmem:[#allocation2 + $0x10] sm:$0xf] }
 0x770   :  { %v1599_v53 = vld [vmem:[#allocation2 + $0x18] sm:$0xf]  ;;  %v1602_v54 = vpack.c.bf16 %v1598_v52, %v1598_v52  ;;  %v2719_v49 = vld [vmem:[%s3463_s11 + $0x30] sm:$0xff]  }
 0x771   :  { %1892 = vmatprep.mubr.bf16.mxu0 %v1601_v51  ;;  %v1603_v55 = vpack.c.bf16 %v1599_v53, %v1599_v53  ;;  %v2721_v51 = vld [vmem:[%s3463_s11 + $0x38] sm:$0xff]  }
 0x772   :  { %1893 = vmatmul.mubr.bf16.vlgmr.msra.gmra.mrb[16].mxu0 %v1600_v50  ;;  %v2720_v50 = vld [vmem:[%s3463_s11 + $0x78] sm:$0xff]  }
 0x773   :  { %1932 = vmatprep.mubr.bf16.mxu1 %v1603_v55  ;;  %2549 = vmatpush3.bf16.msra.mxu0 %v2707_v32 }
 0x774   :  { %1933 = vmatmul.mubr.bf16.vlgmr.msra.gmra.mrb[16].mxu1 %v1602_v54  ;;  %2550 = vmatprep.subr.bf16.mxu0 %v2708_v38 }
 0x777   :  { %2551 = vmatpush3.bf16.msra.mxu0 %v2709_v39 }
 0x778   :  { %2552 = vmatprep.subr.bf16.mxu0 %v2710_v40 }
 0x77b   :  { %2553 = vmatpush3.bf16.msra.mxu0 %v2711_v42 }
 0x77c   :  { %2554 = vmatprep.subr.bf16.mxu0 %v2712_v44 }
 0x77f   :  { %2555 = vmatpush3.bf16.msra.mxu0 %v2713_v45 }
 0x780   :  { %2556 = vmatprep.subr.bf16.mxu0 %v2714_v0 }
 0x783   :  { %2557 = vmatpush3.bf16.msra.mxu0 %v2715_v46 }
 0x784   :  { %2558 = vmatprep.subr.bf16.mxu0 %v2716_v29 }
 0x787   :  { %2559 = vmatpush3.bf16.msra.mxu0 %v2717_v47 }
 0x788   :  { %2560 = vmatprep.subr.bf16.mxu0 %v2718_v48 }
 0x78b   :  { %2561 = vmatpush3.bf16.msra.mxu0 %v2719_v49 }
 0x78c   :  { %2562 = vmatprep.subr.bf16.mxu0 %v2720_v50 }
 0x78f   :  { %2563 = vmatpush3.bf16.msra.mxu0 %v2721_v51 }
 0x845   :  { %v2520_v56 = vpop.f32.mrb[16].mxu0 }
 0x846   :  { %v2521_v57 = vpop.f32.mrb[17].mxu0 }
 0x847   :  { %v2542_v59 = vpop.f32.mrb[16].mxu1  ;;  %v2522_v60 = vadd.f32 %v2521_v57, %v2520_v56  ;;  %v2523_v61 = vpop.f32.mrb[18].mxu0 }
 0x848   :  { %v2543_v62 = vpop.f32.mrb[17].mxu1  ;;  %v2524_v1 = vpop.f32.mrb[19].mxu0 }
 0x849   :  { %v2544_v2 = vadd.f32 %v2543_v62, %v2542_v59  ;;  %v2545_v3 = vpop.f32.mrb[18].mxu1 }
 0x84a   :  { %v2546_v4 = vpop.f32.mrb[19].mxu1 }
 0x84b   :  { %v1935_v5 = vadd.f32 %v2544_v2, %v2522_v60 }
 0x84d   :  { %v1941_v6 = vsel %vm1940_vm7, %v1935_v5, 0.0 }
 0x84e   :  { %v1942_v7 = vrot.slane %v1941_v6, 4 }
 0x850   :  { %v1943_v8 = vadd.f32 %v1942_v7, %v1941_v6 }
 0x852   :  { %v1944_v9 = vrot.slane %v1943_v8, 2 }
 0x854   :  { %v1945_v11 = vadd.f32 %v1944_v9, %v1943_v8 }
 0x856   :  { %v1946_v12 = vrot.slane %v1945_v11, 1 }
 0x858   :  { %v1947_v13 = vadd.f32 %v1946_v12, %v1945_v11 }
 0x85a   :  { %1949 = vrot.lane.b32.xlu0 %v1947_v13, %s2731_s30 }
 0x8cc   :  { %v1950_v14 = vpop.permute.xlu0 %1949 }
 0x8cd   :  { %v1952_v15 = vadd.f32 %v1950_v14, %v1947_v13 }
 0x8cf   :  { %v1953_v16 = vmul.f32 0.125, %v1952_v15 }
 0x8d1   :  { %1955 = vrot.lane.b32.xlu1 %v1953_v16, %s2731_s30 }
 0x943   :  { %v1956_v17 = vpop.permute.xlu1 %1955 }
 0x944   :  { %v1958_v18 = vsel %vm928_vm3, %v1953_v16, %v1956_v17 }
 0x945   :  { %v1962_v19 = vrot.slane %v1958_v18, %v3066_v58 }
 0x947   :  { %v3381_v20 = vsub.f32 %v1935_v5, %v1962_v19 }
 0x949   :  { %v1964_v21 = vmul.f32 %v3381_v20, %v3381_v20 }
 0x94b   :  { %v1965_v22 = vsel %vm1940_vm7, %v1964_v21, 0.0 }
 0x94c   :  { %v1966_v10 = vrot.slane %v1965_v22, 4 }
 0x94e   :  { %v1967_v23 = vadd.f32 %v1966_v10, %v1965_v22 }
 0x950   :  { %v1968_v24 = vrot.slane %v1967_v23, 2 }
 0x952   :  { %v1969_v25 = vadd.f32 %v1968_v24, %v1967_v23 }
 0x954   :  { %v1970_v26 = vrot.slane %v1969_v25, 1 }
 0x956   :  { %v1971_v27 = vadd.f32 %v1970_v26, %v1969_v25 }
 0x958   :  { %1973 = vrot.lane.b32.xlu0 %v1971_v27, %s2731_s30 }
 0x95c   :  { %2002 = vrot.lane.b32.xlu0 %v2001_v30, %s2731_s30 }
 0x9ca   :  { %v1974_v33 = vpop.permute.xlu0 %1973 }
 0x9cb   :  { %v1976_v34 = vadd.f32 %v1974_v33, %v1971_v27 }
 0x9cd   :  { %v1977_v35 = vmul.f32 0.125, %v1976_v34 }
 0x9ce   :  { %v2003_v52 = vpop.permute.xlu0 %2002 }
 0x9cf   :  { %v1979_v36 = vadd.f32 1e-05, %v1977_v35  ;;  %v2005_v53 = vsel %vm928_vm3, %v1996_v28, %v2003_v52 }
 0x9d0   :  { %v2009_v57 = vrot.slane %v2005_v53, %v3066_v58 }
 0x9d1   :  { %2726 = vrsqrt.f32 %v1979_v36 }
 0x9db   :  { %v2727_v43 = vpop.eup %2726 }
 0x9dc   :  { %v1981_v37 = vmul.f32 %v2727_v43, %v1978_v41 }
 0x9de   :  { %v1986_v63 = vrot.slane %v1981_v37, %v3066_v58 }
 0x9e0   :  { %1987 = vrot.lane.b32.xlu1 %v1986_v63, %s2731_s30 }
 0xa52   :  { %v1988_v54 = vpop.permute.xlu1 %1987 }
 0xa53   :  { %v1990_v55 = vsel %vm928_vm3, %v1981_v37, %v1988_v54 }
 0xa54   :  { %v1994_v56 = vrot.slane %v1990_v55, %v3066_v58 }
 0xa56   :  { %v1995_v59 = vmul.f32 %v1994_v56, %v3381_v20 }
 0xa58   :  { %v2010_v60 = vadd.f32 %v2009_v57, %v1995_v59 }
 0xa5a   :  { %v2011_v61 = vmul.f32 0.2, %v2010_v60 }
 0xa5c   :  { %v2012_v62 = vmax.f32 %v2010_v60, %v2011_v61 }
 0xa5e   :  { %2013 = vst [vmem:[#allocation6] sm:$0xf] %v2012_v62  }
 0xa65   :  { %v2015_v1 = vld [vmem:[#allocation6] sm:$0x1]  ;;  %v2017_v2 = vld [vmem:[#allocation6 + $0x1] sm:$0x1]  ;;  %v2019_v3 = vld [vmem:[#allocation6 + $0x2] sm:$0x1] }
 0xa66   :  { %v2021_v4 = vld [vmem:[#allocation6 + $0x3] sm:$0x1]  ;;  %2016 = vst [vmem:[#allocation2] sm:$0x1] %v2015_v1  ;;  %2018 = vst [vmem:[#allocation2 + $0x8] sm:$0x1] %v2017_v2 }
 0xa67   :  { %2020 = vst [vmem:[#allocation2 + $0x1] sm:$0x1] %v2019_v3  ;;  %2022 = vst [vmem:[#allocation2 + $0x9] sm:$0x1] %v2021_v4 }
 0xa6e   :  { %v2023_v5 = vld [vmem:[#allocation2] sm:$0x3]  ;;  %v2024_v6 = vld [vmem:[#allocation2 + $0x8] sm:$0x3] }
 0xa6f   :  { %v2025_v7 = vpack.c.bf16 %v2023_v5, %v2023_v5  ;;  %v2026_v8 = vpack.c.bf16 %v2024_v6, %v2024_v6 }
 0xa71   :  { %2187 = vmatprep.mubr.bf16.mxu0 %v2026_v8 }
 0xa72   :  { %2188 = vmatmul.mubr.bf16.vlgmr.msra.gmra.mrb[20].mxu0 %v2025_v7 }
 0xb45   :  { %v2564_v58 = vpop.f32.mrb[20].mxu0 }
 0xb46   :  { %v2565_v9 = vpop.f32.mrb[21].mxu0 }
 0xb47   :  { %v2566_v11 = vadd.f32 %v2565_v9, %v2564_v58  ;;  %v2567_v12 = vpop.f32.mrb[22].mxu0 }
 0xb48   :  { %v2568_v13 = vpop.f32.mrb[23].mxu0 }
 0xb49   :  { %2196 = vst.msk [vmem:[%s3465_s12] sm:$0x3] %vm2195_vm8, %v2566_v11 }

</bundles_post_ra>
